<compile_context>
chip_gen: v5e
topology: v5e:2x2
jax: 0.10.0
libtpu: 0.0.40
codegen_flags: <defaults>
</compile_context>

<pallas_src>
import math

import jax
import jax.numpy as jnp
from jax.experimental import pallas as pl
from jax.experimental.pallas import tpu as pltpu


def _round_up(n: int, m: int) -> int:
    return ((n + m - 1) // m) * m


# --------------------------------------------------------------------------- kernel
def _lstm_recurrence_kernel(gx_ref, whh_ref, h_out_ref):
    """Serial LSTM recurrence over time (single invocation, whole sequence in VMEM).

    gx_ref  : (S, Bp, 4*Hp) f32  precomputed x_t @ W_ih^T + (b_ih + b_hh); gate order
                                 i, f, g, o with each gate zero-padded to Hp lanes.
    whh_ref : (Hp, 4*Hp)         recurrent weights (f32, or bf16 for the MXU).
    h_out_ref: (Bp, Hp) f32      last hidden state h_T.
    """
    S, Bp, G = gx_ref.shape
    Hp = G // 4
    whh = whh_ref[...]            # hoisted out of the loop (lives in vregs)
    mm_dtype = whh.dtype

    def step(t, carry):
        h, c = carry
        h_mm = h if mm_dtype == jnp.float32 else h.astype(mm_dtype)
        gates = gx_ref[t] + jnp.dot(h_mm, whh, preferred_element_type=jnp.float32)
        # Hp is a multiple of 128 -> all four gate slices are lane-aligned.
        i_g = jax.nn.sigmoid(gates[:, 0 * Hp:1 * Hp])
        f_g = jax.nn.sigmoid(gates[:, 1 * Hp:2 * Hp])
        g_g = jnp.tanh(gates[:, 2 * Hp:3 * Hp])
        o_g = jax.nn.sigmoid(gates[:, 3 * Hp:4 * Hp])
        c_new = f_g * c + i_g * g_g
        h_new = o_g * jnp.tanh(c_new)
        return h_new, c_new

    h0 = jnp.zeros((Bp, Hp), jnp.float32)
    c0 = jnp.zeros((Bp, Hp), jnp.float32)
    h_T, _ = jax.lax.fori_loop(0, S, step, (h0, c0), unroll=True)
    h_out_ref[...] = h_T


# -------------------------------------------------------------------------- wrapper
def lstm_model_forward(x, kparams):
    """x: (batch, seq, input_dim) f32 -> (batch, output_dim) f32."""
    B, S, I = x.shape
    w_ih_t = kparams["w_ih_t"]    # (I, 4*Hp)
    w_hh_t = kparams["w_hh_t"]    # (Hp, 4*Hp)   f32 or bf16
    b = kparams["b"]              # (1, 4*Hp)
    w_fc_t = kparams["w_fc_t"]    # (H, O)
    b_fc = kparams["b_fc"]        # (1, O)
    Hp = w_hh_t.shape[0]
    H = w_fc_t.shape[0]

    Bp = _round_up(B, 8)          # f32 sublane tile

    # ---- time-parallel input projection: one big (S*Bp, I) x (I, 4Hp) matmul in XLA
    x_p = jnp.pad(x, ((0, Bp - B), (0, 0), (0, 0)))       # (Bp, S, I)
    x_tm = jnp.transpose(x_p, (1, 0, 2))                   # (S, Bp, I) time-major
    gx = (jnp.dot(x_tm.reshape(S * Bp, I), w_ih_t,
                  preferred_element_type=jnp.float32) + b)
    gx = gx.reshape(S, Bp, 4 * Hp)

    # ---- recurrent part (Pallas): only h @ W_hh^T + gate math per timestep
    flops = 2 * S * Bp * Hp * (4 * Hp) + 12 * S * Bp * Hp
    transcendentals = 5 * S * Bp * Hp
    bytes_accessed = (gx.size * gx.dtype.itemsize
                      + w_hh_t.size * w_hh_t.dtype.itemsize
                      + Bp * Hp * 4)

    h_T = pl.pallas_call(
        _lstm_recurrence_kernel,
        out_shape=jax.ShapeDtypeStruct((Bp, Hp), jnp.float32),
        in_specs=[
            pl.BlockSpec(memory_space=pltpu.MemorySpace.VMEM),   # gx  (whole array)
            pl.BlockSpec(memory_space=pltpu.MemorySpace.VMEM),   # W_hh^T (single copy)
        ],
        out_specs=pl.BlockSpec(memory_space=pltpu.MemorySpace.VMEM),
        cost_estimate=pl.CostEstimate(
            flops=flops,
            transcendentals=transcendentals,
            bytes_accessed=bytes_accessed),
        compiler_params=pltpu.CompilerParams(
            vmem_limit_bytes=32 * 1024 * 1024),
    )(gx, w_hh_t)

    # ---- final FC on the last hidden state, in XLA (O=4 lanes stays out of kernel)
    return h_T[:B, :H] @ w_fc_t + b_fc


# --------------------------------------------------------------------------- params
def init_params(key, input_dim, hidden_dim, output_dim):
    """PyTorch-shaped weights, uniform(-1/sqrt(H), 1/sqrt(H)) like nn.LSTM/nn.Linear."""
    ks = jax.random.split(key, 6)
    bound = 1.0 / math.sqrt(hidden_dim)
    u = lambda k, shape: jax.random.uniform(k, shape, jnp.float32, -bound, bound)
    return {
        "w_ih": u(ks[0], (4 * hidden_dim, input_dim)),    # weight_ih_l0
        "w_hh": u(ks[1], (4 * hidden_dim, hidden_dim)),   # weight_hh_l0
        "b_ih": u(ks[2], (4 * hidden_dim,)),
        "b_hh": u(ks[3], (4 * hidden_dim,)),
        "w_fc": u(ks[4], (output_dim, hidden_dim)),       # nn.Linear weight
        "b_fc": u(ks[5], (output_dim,)),
    }


def prepare_params(raw, hidden_dim, use_bf16_matmul=False):
    """Pad each gate block H -> Hp (multiple of 128), transpose for x @ W layouts."""
    H = hidden_dim
    Hp = _round_up(H, 128)

    def pad_gate_rows(w):  # (4H, X) -> (4Hp, X), per-gate zero pad, keeps i,f,g,o order
        w4 = w.reshape(4, H, -1)
        return jnp.pad(w4, ((0, 0), (0, Hp - H), (0, 0))).reshape(4 * Hp, -1)

    w_ih_p = pad_gate_rows(raw["w_ih"])                                   # (4Hp, I)
    w_hh_p = pad_gate_rows(jnp.pad(raw["w_hh"], ((0, 0), (0, Hp - H))))   # (4Hp, Hp)
    b = (raw["b_ih"] + raw["b_hh"]).reshape(4, H)
    b_p = jnp.pad(b, ((0, 0), (0, Hp - H))).reshape(1, 4 * Hp)

    w_hh_t = w_hh_p.T                                                     # (Hp, 4Hp)
    if use_bf16_matmul:
        # v6e/v7x: bf16 weights into the MXU; accumulation + gate math stay f32.
        w_hh_t = w_hh_t.astype(jnp.bfloat16)

    return {
        "w_ih_t": w_ih_p.T,                    # (I, 4Hp)
        "w_hh_t": w_hh_t,                      # (Hp, 4Hp)
        "b": b_p,                              # (1, 4Hp)
        "w_fc_t": raw["w_fc"].T,               # (H, O)
        "b_fc": raw["b_fc"].reshape(1, -1),    # (1, O)
    }


# ------------------------------------------------------------------------ reference
def _reference_forward(x, raw):
    """Pure-JAX f32 reference of the same LSTM forward (unpadded weights)."""
    B, S, I = x.shape
    H = raw["w_hh"].shape[1]
    Wih, Whh = raw["w_ih"].T, raw["w_hh"].T
    b = raw["b_ih"] + raw["b_hh"]
    h = jnp.zeros((B, H), jnp.float32)
    c = jnp.zeros((B, H), jnp.float32)
    for t in range(S):
        g = x[:, t, :] @ Wih + h @ Whh + b
        i = jax.nn.sigmoid(g[:, 0 * H:1 * H])
        f = jax.nn.sigmoid(g[:, 1 * H:2 * H])
        gg = jnp.tanh(g[:, 2 * H:3 * H])
        o = jax.nn.sigmoid(g[:, 3 * H:4 * H])
        c = f * c + i * gg
        h = o * jnp.tanh(c)
    return h @ raw["w_fc"].T + raw["b_fc"]


if __name__ == "__main__":
    batch, seq, input_dim, hidden_dim, output_dim = 2, 8, 16, 32, 4

    key = jax.random.PRNGKey(0)
    k_x, k_p = jax.random.split(key)
    x = jax.random.normal(k_x, (batch, seq, input_dim), jnp.float32)

    raw = init_params(k_p, input_dim, hidden_dim, output_dim)
    kparams = prepare_params(raw, hidden_dim, use_bf16_matmul=False)

    out = lstm_model_forward(x, kparams)
    out = jax.block_until_ready(out)

    ref = _reference_forward(x, raw)
    assert out.shape == (batch, output_dim)
    assert jnp.allclose(out, ref, atol=1e-4, rtol=1e-4)

    print("KERNEL_OK")
</pallas_src>

<mosaic_0001>
module attributes {stable_mosaic.version = 11 : i64} {
  func.func @_lstm_recurrence_kernel(%arg0: memref<8x8x512xf32, #tpu.memory_space<vmem>>, %arg1: memref<128x512xf32, #tpu.memory_space<vmem>>, %arg2: memref<8x128xf32, #tpu.memory_space<vmem>>) attributes {dimension_semantics = [], scalar_prefetch = 0 : i64, scratch_operands = 0 : i64, tpu.core_type = #tpu.core_type<tc>} {
    %c0 = arith.constant 0 : index
    %c0_0 = arith.constant 0 : index
    %0 = vector.load %arg1[%c0, %c0_0] : memref<128x512xf32, #tpu.memory_space<vmem>>, vector<128x512xf32>
    %cst = arith.constant 0.000000e+00 : f32
    %1 = vector.broadcast %cst : f32 to vector<8x128xf32>
    %cst_1 = arith.constant 0.000000e+00 : f32
    %2 = vector.broadcast %cst_1 : f32 to vector<8x128xf32>
    %c0_i32 = arith.constant 0 : i32
    %3 = arith.index_cast %c0_i32 : i32 to index
    %c0_2 = arith.constant 0 : index
    %c0_3 = arith.constant 0 : index
    %4 = vector.load %arg0[%3, %c0_2, %c0_3] : memref<8x8x512xf32, #tpu.memory_space<vmem>>, vector<1x8x512xf32>
    %5 = vector.shape_cast %4 : vector<1x8x512xf32> to vector<8x512xf32>
    %cst_4 = arith.constant dense<0.000000e+00> : vector<8x512xf32>
    %6 = tpu.matmul %1, %0, %cst_4 {dimension_numbers = #tpu.dot_dimension_numbers<[1], [0], [0], [1], [0, 0, 1, 1], [], []>} : vector<8x128xf32>, vector<128x512xf32>, vector<8x512xf32> -> vector<8x512xf32>
    %7 = arith.addf %5, %6 : vector<8x512xf32>
    %8 = vector.extract_strided_slice %7 {offsets = [0, 0], sizes = [8, 128], strides = [1, 1]} : vector<8x512xf32> to vector<8x128xf32>
    %9 = arith.negf %8 : vector<8x128xf32>
    %10 = math.exp %9 : vector<8x128xf32>
    %cst_5 = arith.constant 1.000000e+00 : f32
    %11 = vector.broadcast %cst_5 : f32 to vector<8x128xf32>
    %12 = arith.addf %11, %10 : vector<8x128xf32>
    %13 = arith.divf %11, %12 : vector<8x128xf32>
    %14 = vector.extract_strided_slice %7 {offsets = [0, 128], sizes = [8, 128], strides = [1, 1]} : vector<8x512xf32> to vector<8x128xf32>
    %15 = arith.negf %14 : vector<8x128xf32>
    %16 = math.exp %15 : vector<8x128xf32>
    %cst_6 = arith.constant 1.000000e+00 : f32
    %17 = vector.broadcast %cst_6 : f32 to vector<8x128xf32>
    %18 = arith.addf %17, %16 : vector<8x128xf32>
    %19 = arith.divf %17, %18 : vector<8x128xf32>
    %20 = vector.extract_strided_slice %7 {offsets = [0, 256], sizes = [8, 128], strides = [1, 1]} : vector<8x512xf32> to vector<8x128xf32>
    %21 = math.tanh %20 : vector<8x128xf32>
    %22 = vector.extract_strided_slice %7 {offsets = [0, 384], sizes = [8, 128], strides = [1, 1]} : vector<8x512xf32> to vector<8x128xf32>
    %23 = arith.negf %22 : vector<8x128xf32>
    %24 = math.exp %23 : vector<8x128xf32>
    %cst_7 = arith.constant 1.000000e+00 : f32
    %25 = vector.broadcast %cst_7 : f32 to vector<8x128xf32>
    %26 = arith.addf %25, %24 : vector<8x128xf32>
    %27 = arith.divf %25, %26 : vector<8x128xf32>
    %28 = arith.mulf %19, %2 : vector<8x128xf32>
    %29 = arith.mulf %13, %21 : vector<8x128xf32>
    %30 = arith.addf %28, %29 : vector<8x128xf32>
    %31 = math.tanh %30 : vector<8x128xf32>
    %32 = arith.mulf %27, %31 : vector<8x128xf32>
    %c1_i32 = arith.constant 1 : i32
    %33 = arith.index_cast %c1_i32 : i32 to index
    %c0_8 = arith.constant 0 : index
    %c0_9 = arith.constant 0 : index
    %34 = vector.load %arg0[%33, %c0_8, %c0_9] : memref<8x8x512xf32, #tpu.memory_space<vmem>>, vector<1x8x512xf32>
    %35 = vector.shape_cast %34 : vector<1x8x512xf32> to vector<8x512xf32>
    %cst_10 = arith.constant dense<0.000000e+00> : vector<8x512xf32>
    %36 = tpu.matmul %32, %0, %cst_10 {dimension_numbers = #tpu.dot_dimension_numbers<[1], [0], [0], [1], [0, 0, 1, 1], [], []>} : vector<8x128xf32>, vector<128x512xf32>, vector<8x512xf32> -> vector<8x512xf32>
    %37 = arith.addf %35, %36 : vector<8x512xf32>
    %38 = vector.extract_strided_slice %37 {offsets = [0, 0], sizes = [8, 128], strides = [1, 1]} : vector<8x512xf32> to vector<8x128xf32>
    %39 = arith.negf %38 : vector<8x128xf32>
    %40 = math.exp %39 : vector<8x128xf32>
    %cst_11 = arith.constant 1.000000e+00 : f32
    %41 = vector.broadcast %cst_11 : f32 to vector<8x128xf32>
    %42 = arith.addf %41, %40 : vector<8x128xf32>
    %43 = arith.divf %41, %42 : vector<8x128xf32>
    %44 = vector.extract_strided_slice %37 {offsets = [0, 128], sizes = [8, 128], strides = [1, 1]} : vector<8x512xf32> to vector<8x128xf32>
    %45 = arith.negf %44 : vector<8x128xf32>
    %46 = math.exp %45 : vector<8x128xf32>
    %cst_12 = arith.constant 1.000000e+00 : f32
    %47 = vector.broadcast %cst_12 : f32 to vector<8x128xf32>
    %48 = arith.addf %47, %46 : vector<8x128xf32>
    %49 = arith.divf %47, %48 : vector<8x128xf32>
    %50 = vector.extract_strided_slice %37 {offsets = [0, 256], sizes = [8, 128], strides = [1, 1]} : vector<8x512xf32> to vector<8x128xf32>
    %51 = math.tanh %50 : vector<8x128xf32>
    %52 = vector.extract_strided_slice %37 {offsets = [0, 384], sizes = [8, 128], strides = [1, 1]} : vector<8x512xf32> to vector<8x128xf32>
    %53 = arith.negf %52 : vector<8x128xf32>
    %54 = math.exp %53 : vector<8x128xf32>
    %cst_13 = arith.constant 1.000000e+00 : f32
    %55 = vector.broadcast %cst_13 : f32 to vector<8x128xf32>
    %56 = arith.addf %55, %54 : vector<8x128xf32>
    %57 = arith.divf %55, %56 : vector<8x128xf32>
    %58 = arith.mulf %49, %30 : vector<8x128xf32>
    %59 = arith.mulf %43, %51 : vector<8x128xf32>
    %60 = arith.addf %58, %59 : vector<8x128xf32>
    %61 = math.tanh %60 : vector<8x128xf32>
    %62 = arith.mulf %57, %61 : vector<8x128xf32>
    %c2_i32 = arith.constant 2 : i32
    %63 = arith.index_cast %c2_i32 : i32 to index
    %c0_14 = arith.constant 0 : index
    %c0_15 = arith.constant 0 : index
    %64 = vector.load %arg0[%63, %c0_14, %c0_15] : memref<8x8x512xf32, #tpu.memory_space<vmem>>, vector<1x8x512xf32>
    %65 = vector.shape_cast %64 : vector<1x8x512xf32> to vector<8x512xf32>
    %cst_16 = arith.constant dense<0.000000e+00> : vector<8x512xf32>
    %66 = tpu.matmul %62, %0, %cst_16 {dimension_numbers = #tpu.dot_dimension_numbers<[1], [0], [0], [1], [0, 0, 1, 1], [], []>} : vector<8x128xf32>, vector<128x512xf32>, vector<8x512xf32> -> vector<8x512xf32>
    %67 = arith.addf %65, %66 : vector<8x512xf32>
    %68 = vector.extract_strided_slice %67 {offsets = [0, 0], sizes = [8, 128], strides = [1, 1]} : vector<8x512xf32> to vector<8x128xf32>
    %69 = arith.negf %68 : vector<8x128xf32>
    %70 = math.exp %69 : vector<8x128xf32>
    %cst_17 = arith.constant 1.000000e+00 : f32
    %71 = vector.broadcast %cst_17 : f32 to vector<8x128xf32>
    %72 = arith.addf %71, %70 : vector<8x128xf32>
    %73 = arith.divf %71, %72 : vector<8x128xf32>
    %74 = vector.extract_strided_slice %67 {offsets = [0, 128], sizes = [8, 128], strides = [1, 1]} : vector<8x512xf32> to vector<8x128xf32>
    %75 = arith.negf %74 : vector<8x128xf32>
    %76 = math.exp %75 : vector<8x128xf32>
    %cst_18 = arith.constant 1.000000e+00 : f32
    %77 = vector.broadcast %cst_18 : f32 to vector<8x128xf32>
    %78 = arith.addf %77, %76 : vector<8x128xf32>
    %79 = arith.divf %77, %78 : vector<8x128xf32>
    %80 = vector.extract_strided_slice %67 {offsets = [0, 256], sizes = [8, 128], strides = [1, 1]} : vector<8x512xf32> to vector<8x128xf32>
    %81 = math.tanh %80 : vector<8x128xf32>
    %82 = vector.extract_strided_slice %67 {offsets = [0, 384], sizes = [8, 128], strides = [1, 1]} : vector<8x512xf32> to vector<8x128xf32>
    %83 = arith.negf %82 : vector<8x128xf32>
    %84 = math.exp %83 : vector<8x128xf32>
    %cst_19 = arith.constant 1.000000e+00 : f32
    %85 = vector.broadcast %cst_19 : f32 to vector<8x128xf32>
    %86 = arith.addf %85, %84 : vector<8x128xf32>
    %87 = arith.divf %85, %86 : vector<8x128xf32>
    %88 = arith.mulf %79, %60 : vector<8x128xf32>
    %89 = arith.mulf %73, %81 : vector<8x128xf32>
    %90 = arith.addf %88, %89 : vector<8x128xf32>
    %91 = math.tanh %90 : vector<8x128xf32>
    %92 = arith.mulf %87, %91 : vector<8x128xf32>
    %c3_i32 = arith.constant 3 : i32
    %93 = arith.index_cast %c3_i32 : i32 to index
    %c0_20 = arith.constant 0 : index
    %c0_21 = arith.constant 0 : index
    %94 = vector.load %arg0[%93, %c0_20, %c0_21] : memref<8x8x512xf32, #tpu.memory_space<vmem>>, vector<1x8x512xf32>
    %95 = vector.shape_cast %94 : vector<1x8x512xf32> to vector<8x512xf32>
    %cst_22 = arith.constant dense<0.000000e+00> : vector<8x512xf32>
    %96 = tpu.matmul %92, %0, %cst_22 {dimension_numbers = #tpu.dot_dimension_numbers<[1], [0], [0], [1], [0, 0, 1, 1], [], []>} : vector<8x128xf32>, vector<128x512xf32>, vector<8x512xf32> -> vector<8x512xf32>
    %97 = arith.addf %95, %96 : vector<8x512xf32>
    %98 = vector.extract_strided_slice %97 {offsets = [0, 0], sizes = [8, 128], strides = [1, 1]} : vector<8x512xf32> to vector<8x128xf32>
    %99 = arith.negf %98 : vector<8x128xf32>
    %100 = math.exp %99 : vector<8x128xf32>
    %cst_23 = arith.constant 1.000000e+00 : f32
    %101 = vector.broadcast %cst_23 : f32 to vector<8x128xf32>
    %102 = arith.addf %101, %100 : vector<8x128xf32>
    %103 = arith.divf %101, %102 : vector<8x128xf32>
    %104 = vector.extract_strided_slice %97 {offsets = [0, 128], sizes = [8, 128], strides = [1, 1]} : vector<8x512xf32> to vector<8x128xf32>
    %105 = arith.negf %104 : vector<8x128xf32>
    %106 = math.exp %105 : vector<8x128xf32>
    %cst_24 = arith.constant 1.000000e+00 : f32
    %107 = vector.broadcast %cst_24 : f32 to vector<8x128xf32>
    %108 = arith.addf %107, %106 : vector<8x128xf32>
    %109 = arith.divf %107, %108 : vector<8x128xf32>
    %110 = vector.extract_strided_slice %97 {offsets = [0, 256], sizes = [8, 128], strides = [1, 1]} : vector<8x512xf32> to vector<8x128xf32>
    %111 = math.tanh %110 : vector<8x128xf32>
    %112 = vector.extract_strided_slice %97 {offsets = [0, 384], sizes = [8, 128], strides = [1, 1]} : vector<8x512xf32> to vector<8x128xf32>
    %113 = arith.negf %112 : vector<8x128xf32>
    %114 = math.exp %113 : vector<8x128xf32>
    %cst_25 = arith.constant 1.000000e+00 : f32
    %115 = vector.broadcast %cst_25 : f32 to vector<8x128xf32>
    %116 = arith.addf %115, %114 : vector<8x128xf32>
    %117 = arith.divf %115, %116 : vector<8x128xf32>
    %118 = arith.mulf %109, %90 : vector<8x128xf32>
    %119 = arith.mulf %103, %111 : vector<8x128xf32>
    %120 = arith.addf %118, %119 : vector<8x128xf32>
    %121 = math.tanh %120 : vector<8x128xf32>
    %122 = arith.mulf %117, %121 : vector<8x128xf32>
    %c4_i32 = arith.constant 4 : i32
    %123 = arith.index_cast %c4_i32 : i32 to index
    %c0_26 = arith.constant 0 : index
    %c0_27 = arith.constant 0 : index
    %124 = vector.load %arg0[%123, %c0_26, %c0_27] : memref<8x8x512xf32, #tpu.memory_space<vmem>>, vector<1x8x512xf32>
    %125 = vector.shape_cast %124 : vector<1x8x512xf32> to vector<8x512xf32>
    %cst_28 = arith.constant dense<0.000000e+00> : vector<8x512xf32>
    %126 = tpu.matmul %122, %0, %cst_28 {dimension_numbers = #tpu.dot_dimension_numbers<[1], [0], [0], [1], [0, 0, 1, 1], [], []>} : vector<8x128xf32>, vector<128x512xf32>, vector<8x512xf32> -> vector<8x512xf32>
    %127 = arith.addf %125, %126 : vector<8x512xf32>
    %128 = vector.extract_strided_slice %127 {offsets = [0, 0], sizes = [8, 128], strides = [1, 1]} : vector<8x512xf32> to vector<8x128xf32>
    %129 = arith.negf %128 : vector<8x128xf32>
    %130 = math.exp %129 : vector<8x128xf32>
    %cst_29 = arith.constant 1.000000e+00 : f32
    %131 = vector.broadcast %cst_29 : f32 to vector<8x128xf32>
    %132 = arith.addf %131, %130 : vector<8x128xf32>
    %133 = arith.divf %131, %132 : vector<8x128xf32>
    %134 = vector.extract_strided_slice %127 {offsets = [0, 128], sizes = [8, 128], strides = [1, 1]} : vector<8x512xf32> to vector<8x128xf32>
    %135 = arith.negf %134 : vector<8x128xf32>
    %136 = math.exp %135 : vector<8x128xf32>
    %cst_30 = arith.constant 1.000000e+00 : f32
    %137 = vector.broadcast %cst_30 : f32 to vector<8x128xf32>
    %138 = arith.addf %137, %136 : vector<8x128xf32>
    %139 = arith.divf %137, %138 : vector<8x128xf32>
    %140 = vector.extract_strided_slice %127 {offsets = [0, 256], sizes = [8, 128], strides = [1, 1]} : vector<8x512xf32> to vector<8x128xf32>
    %141 = math.tanh %140 : vector<8x128xf32>
    %142 = vector.extract_strided_slice %127 {offsets = [0, 384], sizes = [8, 128], strides = [1, 1]} : vector<8x512xf32> to vector<8x128xf32>
    %143 = arith.negf %142 : vector<8x128xf32>
    %144 = math.exp %143 : vector<8x128xf32>
    %cst_31 = arith.constant 1.000000e+00 : f32
    %145 = vector.broadcast %cst_31 : f32 to vector<8x128xf32>
    %146 = arith.addf %145, %144 : vector<8x128xf32>
    %147 = arith.divf %145, %146 : vector<8x128xf32>
    %148 = arith.mulf %139, %120 : vector<8x128xf32>
    %149 = arith.mulf %133, %141 : vector<8x128xf32>
    %150 = arith.addf %148, %149 : vector<8x128xf32>
    %151 = math.tanh %150 : vector<8x128xf32>
    %152 = arith.mulf %147, %151 : vector<8x128xf32>
    %c5_i32 = arith.constant 5 : i32
    %153 = arith.index_cast %c5_i32 : i32 to index
    %c0_32 = arith.constant 0 : index
    %c0_33 = arith.constant 0 : index
    %154 = vector.load %arg0[%153, %c0_32, %c0_33] : memref<8x8x512xf32, #tpu.memory_space<vmem>>, vector<1x8x512xf32>
    %155 = vector.shape_cast %154 : vector<1x8x512xf32> to vector<8x512xf32>
    %cst_34 = arith.constant dense<0.000000e+00> : vector<8x512xf32>
    %156 = tpu.matmul %152, %0, %cst_34 {dimension_numbers = #tpu.dot_dimension_numbers<[1], [0], [0], [1], [0, 0, 1, 1], [], []>} : vector<8x128xf32>, vector<128x512xf32>, vector<8x512xf32> -> vector<8x512xf32>
    %157 = arith.addf %155, %156 : vector<8x512xf32>
    %158 = vector.extract_strided_slice %157 {offsets = [0, 0], sizes = [8, 128], strides = [1, 1]} : vector<8x512xf32> to vector<8x128xf32>
    %159 = arith.negf %158 : vector<8x128xf32>
    %160 = math.exp %159 : vector<8x128xf32>
    %cst_35 = arith.constant 1.000000e+00 : f32
    %161 = vector.broadcast %cst_35 : f32 to vector<8x128xf32>
    %162 = arith.addf %161, %160 : vector<8x128xf32>
    %163 = arith.divf %161, %162 : vector<8x128xf32>
    %164 = vector.extract_strided_slice %157 {offsets = [0, 128], sizes = [8, 128], strides = [1, 1]} : vector<8x512xf32> to vector<8x128xf32>
    %165 = arith.negf %164 : vector<8x128xf32>
    %166 = math.exp %165 : vector<8x128xf32>
    %cst_36 = arith.constant 1.000000e+00 : f32
    %167 = vector.broadcast %cst_36 : f32 to vector<8x128xf32>
    %168 = arith.addf %167, %166 : vector<8x128xf32>
    %169 = arith.divf %167, %168 : vector<8x128xf32>
    %170 = vector.extract_strided_slice %157 {offsets = [0, 256], sizes = [8, 128], strides = [1, 1]} : vector<8x512xf32> to vector<8x128xf32>
    %171 = math.tanh %170 : vector<8x128xf32>
    %172 = vector.extract_strided_slice %157 {offsets = [0, 384], sizes = [8, 128], strides = [1, 1]} : vector<8x512xf32> to vector<8x128xf32>
    %173 = arith.negf %172 : vector<8x128xf32>
    %174 = math.exp %173 : vector<8x128xf32>
    %cst_37 = arith.constant 1.000000e+00 : f32
    %175 = vector.broadcast %cst_37 : f32 to vector<8x128xf32>
    %176 = arith.addf %175, %174 : vector<8x128xf32>
    %177 = arith.divf %175, %176 : vector<8x128xf32>
    %178 = arith.mulf %169, %150 : vector<8x128xf32>
    %179 = arith.mulf %163, %171 : vector<8x128xf32>
    %180 = arith.addf %178, %179 : vector<8x128xf32>
    %181 = math.tanh %180 : vector<8x128xf32>
    %182 = arith.mulf %177, %181 : vector<8x128xf32>
    %c6_i32 = arith.constant 6 : i32
    %183 = arith.index_cast %c6_i32 : i32 to index
    %c0_38 = arith.constant 0 : index
    %c0_39 = arith.constant 0 : index
    %184 = vector.load %arg0[%183, %c0_38, %c0_39] : memref<8x8x512xf32, #tpu.memory_space<vmem>>, vector<1x8x512xf32>
    %185 = vector.shape_cast %184 : vector<1x8x512xf32> to vector<8x512xf32>
    %cst_40 = arith.constant dense<0.000000e+00> : vector<8x512xf32>
    %186 = tpu.matmul %182, %0, %cst_40 {dimension_numbers = #tpu.dot_dimension_numbers<[1], [0], [0], [1], [0, 0, 1, 1], [], []>} : vector<8x128xf32>, vector<128x512xf32>, vector<8x512xf32> -> vector<8x512xf32>
    %187 = arith.addf %185, %186 : vector<8x512xf32>
    %188 = vector.extract_strided_slice %187 {offsets = [0, 0], sizes = [8, 128], strides = [1, 1]} : vector<8x512xf32> to vector<8x128xf32>
    %189 = arith.negf %188 : vector<8x128xf32>
    %190 = math.exp %189 : vector<8x128xf32>
    %cst_41 = arith.constant 1.000000e+00 : f32
    %191 = vector.broadcast %cst_41 : f32 to vector<8x128xf32>
    %192 = arith.addf %191, %190 : vector<8x128xf32>
    %193 = arith.divf %191, %192 : vector<8x128xf32>
    %194 = vector.extract_strided_slice %187 {offsets = [0, 128], sizes = [8, 128], strides = [1, 1]} : vector<8x512xf32> to vector<8x128xf32>
    %195 = arith.negf %194 : vector<8x128xf32>
    %196 = math.exp %195 : vector<8x128xf32>
    %cst_42 = arith.constant 1.000000e+00 : f32
    %197 = vector.broadcast %cst_42 : f32 to vector<8x128xf32>
    %198 = arith.addf %197, %196 : vector<8x128xf32>
    %199 = arith.divf %197, %198 : vector<8x128xf32>
    %200 = vector.extract_strided_slice %187 {offsets = [0, 256], sizes = [8, 128], strides = [1, 1]} : vector<8x512xf32> to vector<8x128xf32>
    %201 = math.tanh %200 : vector<8x128xf32>
    %202 = vector.extract_strided_slice %187 {offsets = [0, 384], sizes = [8, 128], strides = [1, 1]} : vector<8x512xf32> to vector<8x128xf32>
    %203 = arith.negf %202 : vector<8x128xf32>
    %204 = math.exp %203 : vector<8x128xf32>
    %cst_43 = arith.constant 1.000000e+00 : f32
    %205 = vector.broadcast %cst_43 : f32 to vector<8x128xf32>
    %206 = arith.addf %205, %204 : vector<8x128xf32>
    %207 = arith.divf %205, %206 : vector<8x128xf32>
    %208 = arith.mulf %199, %180 : vector<8x128xf32>
    %209 = arith.mulf %193, %201 : vector<8x128xf32>
    %210 = arith.addf %208, %209 : vector<8x128xf32>
    %211 = math.tanh %210 : vector<8x128xf32>
    %212 = arith.mulf %207, %211 : vector<8x128xf32>
    %c7_i32 = arith.constant 7 : i32
    %213 = arith.index_cast %c7_i32 : i32 to index
    %c0_44 = arith.constant 0 : index
    %c0_45 = arith.constant 0 : index
    %214 = vector.load %arg0[%213, %c0_44, %c0_45] : memref<8x8x512xf32, #tpu.memory_space<vmem>>, vector<1x8x512xf32>
    %215 = vector.shape_cast %214 : vector<1x8x512xf32> to vector<8x512xf32>
    %cst_46 = arith.constant dense<0.000000e+00> : vector<8x512xf32>
    %216 = tpu.matmul %212, %0, %cst_46 {dimension_numbers = #tpu.dot_dimension_numbers<[1], [0], [0], [1], [0, 0, 1, 1], [], []>} : vector<8x128xf32>, vector<128x512xf32>, vector<8x512xf32> -> vector<8x512xf32>
    %217 = arith.addf %215, %216 : vector<8x512xf32>
    %218 = vector.extract_strided_slice %217 {offsets = [0, 0], sizes = [8, 128], strides = [1, 1]} : vector<8x512xf32> to vector<8x128xf32>
    %219 = arith.negf %218 : vector<8x128xf32>
    %220 = math.exp %219 : vector<8x128xf32>
    %cst_47 = arith.constant 1.000000e+00 : f32
    %221 = vector.broadcast %cst_47 : f32 to vector<8x128xf32>
    %222 = arith.addf %221, %220 : vector<8x128xf32>
    %223 = arith.divf %221, %222 : vector<8x128xf32>
    %224 = vector.extract_strided_slice %217 {offsets = [0, 128], sizes = [8, 128], strides = [1, 1]} : vector<8x512xf32> to vector<8x128xf32>
    %225 = arith.negf %224 : vector<8x128xf32>
    %226 = math.exp %225 : vector<8x128xf32>
    %cst_48 = arith.constant 1.000000e+00 : f32
    %227 = vector.broadcast %cst_48 : f32 to vector<8x128xf32>
    %228 = arith.addf %227, %226 : vector<8x128xf32>
    %229 = arith.divf %227, %228 : vector<8x128xf32>
    %230 = vector.extract_strided_slice %217 {offsets = [0, 256], sizes = [8, 128], strides = [1, 1]} : vector<8x512xf32> to vector<8x128xf32>
    %231 = math.tanh %230 : vector<8x128xf32>
    %232 = vector.extract_strided_slice %217 {offsets = [0, 384], sizes = [8, 128], strides = [1, 1]} : vector<8x512xf32> to vector<8x128xf32>
    %233 = arith.negf %232 : vector<8x128xf32>
    %234 = math.exp %233 : vector<8x128xf32>
    %cst_49 = arith.constant 1.000000e+00 : f32
    %235 = vector.broadcast %cst_49 : f32 to vector<8x128xf32>
    %236 = arith.addf %235, %234 : vector<8x128xf32>
    %237 = arith.divf %235, %236 : vector<8x128xf32>
    %238 = arith.mulf %229, %210 : vector<8x128xf32>
    %239 = arith.mulf %223, %231 : vector<8x128xf32>
    %240 = arith.addf %238, %239 : vector<8x128xf32>
    %241 = math.tanh %240 : vector<8x128xf32>
    %242 = arith.mulf %237, %241 : vector<8x128xf32>
    %c8_i32 = arith.constant 8 : i32
    %c0_50 = arith.constant 0 : index
    %c0_51 = arith.constant 0 : index
    %243 = vector.load %arg2[%c0_50, %c0_51] : memref<8x128xf32, #tpu.memory_space<vmem>>, vector<8x128xf32>
    tpu.vector_store %arg2[%c0_50, %c0_51], %242 {strides = array<i32>} : memref<8x128xf32, #tpu.memory_space<vmem>>, vector<8x128xf32>,
    return
  }
}

</mosaic_0001>

<bundles_post_ra>
// kernel: tpu_custom_call.1
= control target key start
LH: loop header
LB: loop body
LE: loop exit
PB: predicated region body
PF: predicated region fallthrough
CT: control target
= control target key end

     0   :  { %7 = vsyncpa [#allocation3], 0  ;;  %s2468_s0 = inlined_call_operand.hbm [shape: f32[8,8,512], index: 0, kind: input, shape index: {}]   ;;  %s2469_s1 = inlined_call_operand.hbm [shape: f32[128,512], index: 1, kind: input, shape index: {}]   ;;  %s2470_s2 = inlined_call_operand.hbm [shape: f32[8,128], index: 2, kind: output, shape index: {}]  }
   0x1   :  { %8 = vsyncpa [#allocation6], 0 }
   0x2   :  { %9 = vsyncpa [#allocation4], 0  ;;  %s14_s11 = sshll.u32 %s2468_s0, 4  ;;  %s1642_s12 = smov [#allocation2]   ;;  %s15_s11 = int_to_ptr.hbm [resolvable:$true] %s14_s11 }
   0x3   :  { %s16_s13 = sshll.u32 %s1642_s12, 4  ;;  %s27_s16 = sshll.u32 %s2469_s1, 4  ;;  %s17_s13 = int_to_ptr.vmem [resolvable:$true] %s16_s13  ;;  %s28_s16 = int_to_ptr.hbm [resolvable:$true] %s27_s16 }
   0x4   :  { %s1643_s17 = smov 512   ;;  %s1644_s18 = smov 32  }
   0x5   :  { %22 = dma.hbm_to_vmem [thread:$0]  %s15_s11, 4096, %s17_s13, [#allocation3], %s1643_s17, %s1643_s17, %s1644_s18  }
   0x6   :  { %s1645_s19 = smov [#allocation5]  }
   0x7   :  { %s29_s20 = sshll.u32 %s1645_s19, 4  ;;  %s30_s20 = int_to_ptr.vmem [resolvable:$true] %s29_s20 }
   0x8   :  { %35 = dma.hbm_to_vmem [thread:$0]  %s28_s16, 8192, %s30_s20, [#allocation6], %s1643_s17, %s1643_s17, %s1644_s18  }
   0x9   :  { %1636 = dma.done.wait [#allocation3], 4096  }
   0xa   :  { %1637 = vsyncadd [#allocation3], 4294963200 }
   0xb   :  { %1638 = dma.done.wait [#allocation6], 8192  }
   0xc   :  { %1639 = vsyncadd [#allocation6], 4294959104  ;;  %v1669_v0 = vld [vmem:[#allocation5 + $0x1e0] sm:$0xff]  ;;  %v1671_v1 = vld [vmem:[#allocation5 + $0x1e8] sm:$0xff]  ;;  %v1646_v60 = vmov 0.0   ;;  %s1647_s0 = smov [#allocation7]  }
   0xd   :  { %2577 = vst [vmem:[#allocation11_spill] sm:$0xff] %v1669_v0  ;;  %v1673_v2 = vld [vmem:[#allocation5 + $0x1f8] sm:$0xff]  ;;  %112 = vmatpush.msra.mxu0 %v1669_v0  ;;  %132 = vmatpush.msra.mxu1 %v1671_v1  ;;  %v1677_v3 = vld [vmem:[#allocation5 + $0x1c0] sm:$0xff]  ;;  %v1679_v4 = vld [vmem:[#allocation5 + $0x1c8] sm:$0xff]  ;;  %s1329_s1 = sshll.u32 %s1647_s0, 4  ;;  %s1331_s23 = sshll.u32 %s2470_s2, 4  ;;  %s1330_s1 = int_to_ptr.vmem [resolvable:$true] %s1329_s1  ;;  %s1332_s23 = int_to_ptr.hbm [resolvable:$true] %s1331_s23 }
   0xe   :  { %v1681_v5 = vld [vmem:[#allocation5 + $0x1d8] sm:$0xff]  ;;  %172 = vmatpush.msra.mxu3 %v1673_v2  ;;  %v1684_v6 = vld [vmem:[#allocation5 + $0x1a0] sm:$0xff]  ;;  %v1686_v7 = vld [vmem:[#allocation5 + $0x1a8] sm:$0xff] }
   0xf   :  { %113 = vmatpush.msra.mxu0 %v1677_v3  ;;  %133 = vmatpush.msra.mxu1 %v1679_v4  ;;  %v1690_v8 = vld [vmem:[#allocation5 + $0x1b8] sm:$0xff]  ;;  %v1693_v9 = vld [vmem:[#allocation5 + $0x180] sm:$0xff]  ;;  %v1695_v10 = vld [vmem:[#allocation5 + $0x188] sm:$0xff] }
  0x10   :  { %173 = vmatpush.msra.mxu3 %v1681_v5  ;;  %v1699_v11 = vld [vmem:[#allocation5 + $0x198] sm:$0xff]  ;;  %v1702_v12 = vld [vmem:[#allocation5 + $0x160] sm:$0xff]  ;;  %v1704_v13 = vld [vmem:[#allocation5 + $0x168] sm:$0xff] }
  0x11   :  { %114 = vmatpush.msra.mxu0 %v1684_v6  ;;  %134 = vmatpush.msra.mxu1 %v1686_v7  ;;  %v1708_v14 = vld [vmem:[#allocation5 + $0x178] sm:$0xff]  ;;  %v1711_v15 = vld [vmem:[#allocation5 + $0x140] sm:$0xff]  ;;  %v1713_v16 = vld [vmem:[#allocation5 + $0x148] sm:$0xff] }
  0x12   :  { %174 = vmatpush.msra.mxu3 %v1690_v8  ;;  %v1715_v17 = vld [vmem:[#allocation5 + $0x1f0] sm:$0xff]  ;;  %v1719_v18 = vld [vmem:[#allocation5 + $0x158] sm:$0xff]  ;;  %v1724_v20 = vld [vmem:[#allocation5 + $0x120] sm:$0xff] }
  0x13   :  { %115 = vmatpush.msra.mxu0 %v1693_v9  ;;  %135 = vmatpush.msra.mxu1 %v1695_v10  ;;  %v1721_v19 = vld [vmem:[#allocation5 + $0x1d0] sm:$0xff]  ;;  %v1726_v21 = vld [vmem:[#allocation5 + $0x128] sm:$0xff]  ;;  %v1731_v22 = vld [vmem:[#allocation5 + $0x138] sm:$0xff] }
  0x14   :  { %175 = vmatpush.msra.mxu3 %v1699_v11  ;;  %152 = vmatpush.msra.mxu2 %v1715_v17  ;;  %v1733_v23 = vld [vmem:[#allocation5 + $0x1b0] sm:$0xff]  ;;  %v1736_v24 = vld [vmem:[#allocation5 + $0x100] sm:$0xff]  ;;  %v1738_v25 = vld [vmem:[#allocation5 + $0x108] sm:$0xff] }
  0x15   :  { %116 = vmatpush.msra.mxu0 %v1702_v12  ;;  %136 = vmatpush.msra.mxu1 %v1704_v13  ;;  %v1743_v26 = vld [vmem:[#allocation5 + $0x118] sm:$0xff]  ;;  %v1745_v27 = vld [vmem:[#allocation5 + $0x190] sm:$0xff]  ;;  %v1748_v28 = vld [vmem:[#allocation5 + $0xe0] sm:$0xff] }
  0x16   :  { %176 = vmatpush.msra.mxu3 %v1708_v14  ;;  %153 = vmatpush.msra.mxu2 %v1721_v19  ;;  %v1750_v29 = vld [vmem:[#allocation5 + $0xe8] sm:$0xff]  ;;  %v1755_v30 = vld [vmem:[#allocation5 + $0xf8] sm:$0xff]  ;;  %v1757_v31 = vld [vmem:[#allocation5 + $0x170] sm:$0xff] }
  0x17   :  { %117 = vmatpush.msra.mxu0 %v1711_v15  ;;  %137 = vmatpush.msra.mxu1 %v1713_v16  ;;  %v1760_v32 = vld [vmem:[#allocation5 + $0xc0] sm:$0xff]  ;;  %v1762_v33 = vld [vmem:[#allocation5 + $0xc8] sm:$0xff]  ;;  %v1767_v34 = vld [vmem:[#allocation5 + $0xd8] sm:$0xff] }
  0x18   :  { %177 = vmatpush.msra.mxu3 %v1719_v18  ;;  %154 = vmatpush.msra.mxu2 %v1733_v23  ;;  %2578 = vst [vmem:[#allocation12_spill] sm:$0xff] %v1767_v34  ;;  %v1769_v35 = vld [vmem:[#allocation5 + $0x150] sm:$0xff]  ;;  %v1772_v36 = vld [vmem:[#allocation5 + $0xa0] sm:$0xff]  ;;  %v1774_v37 = vld [vmem:[#allocation5 + $0xa8] sm:$0xff] }
  0x19   :  { %118 = vmatpush.msra.mxu0 %v1724_v20  ;;  %138 = vmatpush.msra.mxu1 %v1726_v21  ;;  %2579 = vst [vmem:[#allocation13_spill] sm:$0xff] %v1772_v36  ;;  %v1779_v38 = vld [vmem:[#allocation5 + $0xb8] sm:$0xff]  ;;  %v1781_v39 = vld [vmem:[#allocation5 + $0x130] sm:$0xff]  ;;  %v1784_v40 = vld [vmem:[#allocation5 + $0x80] sm:$0xff] }
  0x1a   :  { %178 = vmatpush.msra.mxu3 %v1731_v22  ;;  %155 = vmatpush.msra.mxu2 %v1745_v27  ;;  %2580 = vst [vmem:[#allocation14_spill] sm:$0xff] %v1774_v37  ;;  %v1786_v41 = vld [vmem:[#allocation5 + $0x88] sm:$0xff]  ;;  %v1791_v42 = vld [vmem:[#allocation5 + $0x98] sm:$0xff]  ;;  %v1793_v43 = vld [vmem:[#allocation5 + $0x110] sm:$0xff] }
  0x1b   :  { %119 = vmatpush.msra.mxu0 %v1736_v24  ;;  %139 = vmatpush.msra.mxu1 %v1738_v25  ;;  %2581 = vst [vmem:[#allocation15_spill] sm:$0xff] %v1779_v38  ;;  %v1796_v44 = vld [vmem:[#allocation5 + $0x60] sm:$0xff]  ;;  %v1798_v45 = vld [vmem:[#allocation5 + $0x68] sm:$0xff]  ;;  %v1803_v46 = vld [vmem:[#allocation5 + $0x78] sm:$0xff] }
  0x1c   :  { %179 = vmatpush.msra.mxu3 %v1743_v26  ;;  %156 = vmatpush.msra.mxu2 %v1757_v31  ;;  %2582 = vst [vmem:[#allocation16_spill] sm:$0xff] %v1784_v40  ;;  %v1805_v47 = vld [vmem:[#allocation5 + $0xf0] sm:$0xff]  ;;  %v1808_v48 = vld [vmem:[#allocation5 + $0x40] sm:$0xff]  ;;  %v1810_v49 = vld [vmem:[#allocation5 + $0x48] sm:$0xff] }
  0x1d   :  { %120 = vmatpush.msra.mxu0 %v1748_v28  ;;  %140 = vmatpush.msra.mxu1 %v1750_v29  ;;  %2583 = vst [vmem:[#allocation17_spill] sm:$0xff] %v1786_v41  ;;  %v1815_v50 = vld [vmem:[#allocation5 + $0x58] sm:$0xff]  ;;  %v1817_v51 = vld [vmem:[#allocation5 + $0xd0] sm:$0xff]  ;;  %v1820_v52 = vld [vmem:[#allocation5 + $0x20] sm:$0xff] }
  0x1e   :  { %180 = vmatpush.msra.mxu3 %v1755_v30  ;;  %157 = vmatpush.msra.mxu2 %v1769_v35  ;;  %2584 = vst [vmem:[#allocation18_spill] sm:$0xff] %v1791_v42  ;;  %v1822_v53 = vld [vmem:[#allocation5 + $0x28] sm:$0xff]  ;;  %v1827_v54 = vld [vmem:[#allocation5 + $0x38] sm:$0xff]  ;;  %v1829_v55 = vld [vmem:[#allocation5 + $0xb0] sm:$0xff] }
  0x1f   :  { %121 = vmatpush.msra.mxu0 %v1760_v32  ;;  %141 = vmatpush.msra.mxu1 %v1762_v33  ;;  %2585 = vst [vmem:[#allocation19_spill] sm:$0xff] %v1796_v44  ;;  %v1832_v56 = vld [vmem:[#allocation5] sm:$0xff]  ;;  %v1834_v57 = vld [vmem:[#allocation5 + $0x8] sm:$0xff]  ;;  %v1839_v58 = vld [vmem:[#allocation5 + $0x18] sm:$0xff] }
  0x20   :  { %181 = vmatpush.msra.mxu3 %v1767_v34  ;;  %2586 = vst [vmem:[#allocation20_spill] sm:$0xff] %v1798_v45  ;;  %158 = vmatpush.msra.mxu2 %v1781_v39  ;;  %v1845_v59 = vld [vmem:[#allocation5 + $0x90] sm:$0xff] }
  0x21   :  { %122 = vmatpush.msra.mxu0 %v1772_v36  ;;  %142 = vmatpush.msra.mxu1 %v1774_v37  ;;  %2587 = vst [vmem:[#allocation21_spill] sm:$0xff] %v1803_v46  ;;  %v1848_v61 = vld [vmem:[#allocation5 + $0x70] sm:$0xff] }
  0x22   :  { %182 = vmatpush.msra.mxu3 %v1779_v38  ;;  %2588 = vst [vmem:[#allocation22_spill] sm:$0xff] %v1808_v48  ;;  %159 = vmatpush.msra.mxu2 %v1793_v43  ;;  %v1852_v62 = vld [vmem:[#allocation5 + $0x50] sm:$0xff] }
  0x23   :  { %123 = vmatpush.msra.mxu0 %v1784_v40  ;;  %143 = vmatpush.msra.mxu1 %v1786_v41  ;;  %2589 = vst [vmem:[#allocation23_spill] sm:$0xff] %v1810_v49  ;;  %v1858_v63 = vld [vmem:[#allocation5 + $0x30] sm:$0xff] }
  0x24   :  { %183 = vmatpush.msra.mxu3 %v1791_v42  ;;  %2590 = vst [vmem:[#allocation24_spill] sm:$0xff] %v1815_v50  ;;  %160 = vmatpush.msra.mxu2 %v1805_v47 }
  0x25   :  { %124 = vmatpush.msra.mxu0 %v1796_v44  ;;  %144 = vmatpush.msra.mxu1 %v1798_v45  ;;  %2591 = vst [vmem:[#allocation25_spill] sm:$0xff] %v1817_v51 }
  0x26   :  { %184 = vmatpush.msra.mxu3 %v1803_v46  ;;  %2592 = vst [vmem:[#allocation26_spill] sm:$0xff] %v1820_v52  ;;  %161 = vmatpush.msra.mxu2 %v1817_v51 }
  0x27   :  { %2593 = vst [vmem:[#allocation27_spill] sm:$0xff] %v1822_v53  ;;  %125 = vmatpush.msra.mxu0 %v1808_v48  ;;  %145 = vmatpush.msra.mxu1 %v1810_v49 }
  0x28   :  { %2594 = vst [vmem:[#allocation28_spill] sm:$0xff] %v1827_v54  ;;  %185 = vmatpush.msra.mxu3 %v1815_v50  ;;  %162 = vmatpush.msra.mxu2 %v1829_v55 }
  0x29   :  { %2595 = vst [vmem:[#allocation29_spill] sm:$0xff] %v1829_v55  ;;  %126 = vmatpush.msra.mxu0 %v1820_v52  ;;  %146 = vmatpush.msra.mxu1 %v1822_v53 }
  0x2a   :  { %2596 = vst [vmem:[#allocation30_spill] sm:$0xff] %v1832_v56  ;;  %186 = vmatpush.msra.mxu3 %v1827_v54  ;;  %163 = vmatpush.msra.mxu2 %v1845_v59 }
  0x2b   :  { %2597 = vst [vmem:[#allocation31_spill] sm:$0xff] %v1834_v57  ;;  %127 = vmatpush.msra.mxu0 %v1832_v56  ;;  %147 = vmatpush.msra.mxu1 %v1834_v57 }
  0x2c   :  { %2598 = vst [vmem:[#allocation32_spill] sm:$0xff] %v1839_v58  ;;  %187 = vmatpush.msra.mxu3 %v1839_v58  ;;  %128 = vmatmul.f32.vlgmr.msra.gmra.mxu0 %v1646_v60 }
  0x2d   :  { %2599 = vst [vmem:[#allocation33_spill] sm:$0xff] %v1845_v59  ;;  %148 = vmatmul.f32.vlgmr.msra.gmra.mxu1 %v1646_v60  ;;  %188 = vmatmul.f32.vlgmr.msra.gmra.mxu3 %v1646_v60 }
  0x2e   :  { %2600 = vst [vmem:[#allocation34_spill] sm:$0xff] %v1848_v61  ;;  %264 = vmatpush.msrb.mxu0 %v1669_v0  ;;  %284 = vmatpush.msrb.mxu1 %v1671_v1  ;;  %v1864_v0 = vld [vmem:[#allocation5 + $0x10] sm:$0xff] }
  0x2f   :  { %2601 = vst [vmem:[#allocation35_spill] sm:$0xff] %v1852_v62  ;;  %324 = vmatpush.msrb.mxu3 %v1673_v2  ;;  %164 = vmatpush.msra.mxu2 %v1848_v61 }
  0x30   :  { %265 = vmatpush.msrb.mxu0 %v1677_v3  ;;  %2602 = vst [vmem:[#allocation36_spill] sm:$0xff] %v1858_v63  ;;  %285 = vmatpush.msrb.mxu1 %v1679_v4 }
  0x31   :  { %325 = vmatpush.msrb.mxu3 %v1681_v5  ;;  %165 = vmatpush.msra.mxu2 %v1852_v62  ;;  %2603 = vst [vmem:[#allocation37_spill] sm:$0xff] %v1864_v0 }
  0x32   :  { %266 = vmatpush.msrb.mxu0 %v1684_v6  ;;  %286 = vmatpush.msrb.mxu1 %v1686_v7 }
  0x33   :  { %326 = vmatpush.msrb.mxu3 %v1690_v8  ;;  %166 = vmatpush.msra.mxu2 %v1858_v63 }
  0x34   :  { %267 = vmatpush.msrb.mxu0 %v1693_v9  ;;  %287 = vmatpush.msrb.mxu1 %v1695_v10 }
  0x35   :  { %327 = vmatpush.msrb.mxu3 %v1699_v11  ;;  %167 = vmatpush.msra.mxu2 %v1864_v0 }
  0x36   :  { %268 = vmatpush.msrb.mxu0 %v1702_v12  ;;  %168 = vmatmul.f32.vlgmr.msra.gmra.mxu2 %v1646_v60  ;;  %v2604_v60 = vld [vmem:[#allocation11_spill] sm:$0xff] }
  0x37   :  { %288 = vmatpush.msrb.mxu1 %v1704_v13  ;;  %304 = vmatpush.msrb.mxu2 %v1715_v17 }
  0x38   :  { %328 = vmatpush.msrb.mxu3 %v1708_v14  ;;  %269 = vmatpush.msrb.mxu0 %v1711_v15 }
  0x39   :  { %289 = vmatpush.msrb.mxu1 %v1713_v16  ;;  %305 = vmatpush.msrb.mxu2 %v1721_v19 }
  0x3a   :  { %329 = vmatpush.msrb.mxu3 %v1719_v18  ;;  %270 = vmatpush.msrb.mxu0 %v1724_v20 }
  0x3b   :  { %290 = vmatpush.msrb.mxu1 %v1726_v21  ;;  %306 = vmatpush.msrb.mxu2 %v1733_v23 }
  0x3c   :  { %330 = vmatpush.msrb.mxu3 %v1731_v22  ;;  %271 = vmatpush.msrb.mxu0 %v1736_v24 }
  0x3d   :  { %291 = vmatpush.msrb.mxu1 %v1738_v25  ;;  %307 = vmatpush.msrb.mxu2 %v1745_v27 }
  0x3e   :  { %331 = vmatpush.msrb.mxu3 %v1743_v26  ;;  %272 = vmatpush.msrb.mxu0 %v1748_v28 }
  0x3f   :  { %292 = vmatpush.msrb.mxu1 %v1750_v29  ;;  %308 = vmatpush.msrb.mxu2 %v1757_v31 }
  0x40   :  { %332 = vmatpush.msrb.mxu3 %v1755_v30  ;;  %273 = vmatpush.msrb.mxu0 %v1760_v32 }
  0x41   :  { %293 = vmatpush.msrb.mxu1 %v1762_v33  ;;  %309 = vmatpush.msrb.mxu2 %v1769_v35 }
  0x42   :  { %333 = vmatpush.msrb.mxu3 %v1767_v34  ;;  %274 = vmatpush.msrb.mxu0 %v1772_v36 }
  0x43   :  { %294 = vmatpush.msrb.mxu1 %v1774_v37  ;;  %310 = vmatpush.msrb.mxu2 %v1781_v39 }
  0x44   :  { %334 = vmatpush.msrb.mxu3 %v1779_v38  ;;  %275 = vmatpush.msrb.mxu0 %v1784_v40 }
  0x45   :  { %295 = vmatpush.msrb.mxu1 %v1786_v41  ;;  %311 = vmatpush.msrb.mxu2 %v1793_v43 }
  0x46   :  { %335 = vmatpush.msrb.mxu3 %v1791_v42  ;;  %276 = vmatpush.msrb.mxu0 %v1796_v44 }
  0x47   :  { %296 = vmatpush.msrb.mxu1 %v1798_v45  ;;  %312 = vmatpush.msrb.mxu2 %v1805_v47 }
  0x48   :  { %336 = vmatpush.msrb.mxu3 %v1803_v46  ;;  %277 = vmatpush.msrb.mxu0 %v1808_v48 }
  0x49   :  { %297 = vmatpush.msrb.mxu1 %v1810_v49  ;;  %313 = vmatpush.msrb.mxu2 %v1817_v51 }
  0x4a   :  { %337 = vmatpush.msrb.mxu3 %v1815_v50  ;;  %278 = vmatpush.msrb.mxu0 %v1820_v52 }
  0x4b   :  { %298 = vmatpush.msrb.mxu1 %v1822_v53  ;;  %314 = vmatpush.msrb.mxu2 %v1829_v55 }
  0x4c   :  { %338 = vmatpush.msrb.mxu3 %v1827_v54  ;;  %279 = vmatpush.msrb.mxu0 %v1832_v56 }
  0x4d   :  { %299 = vmatpush.msrb.mxu1 %v1834_v57  ;;  %315 = vmatpush.msrb.mxu2 %v1845_v59 }
  0x4e   :  { %339 = vmatpush.msrb.mxu3 %v1839_v58  ;;  %416 = vmatpush.msra.mxu0 %v2604_v60 }
  0x4f   :  { %436 = vmatpush.msra.mxu1 %v1671_v1  ;;  %316 = vmatpush.msrb.mxu2 %v1848_v61 }
  0x50   :  { %476 = vmatpush.msra.mxu3 %v1673_v2  ;;  %417 = vmatpush.msra.mxu0 %v1677_v3 }
  0x51   :  { %437 = vmatpush.msra.mxu1 %v1679_v4  ;;  %317 = vmatpush.msrb.mxu2 %v1852_v62 }
  0x52   :  { %477 = vmatpush.msra.mxu3 %v1681_v5  ;;  %418 = vmatpush.msra.mxu0 %v1684_v6 }
  0x53   :  { %438 = vmatpush.msra.mxu1 %v1686_v7  ;;  %318 = vmatpush.msrb.mxu2 %v1858_v63 }
  0x54   :  { %478 = vmatpush.msra.mxu3 %v1690_v8  ;;  %419 = vmatpush.msra.mxu0 %v1693_v9 }
  0x55   :  { %439 = vmatpush.msra.mxu1 %v1695_v10  ;;  %319 = vmatpush.msrb.mxu2 %v1864_v0 }
  0x56   :  { %479 = vmatpush.msra.mxu3 %v1699_v11  ;;  %420 = vmatpush.msra.mxu0 %v1702_v12 }
  0x57   :  { %456 = vmatpush.msra.mxu2 %v1715_v17  ;;  %440 = vmatpush.msra.mxu1 %v1704_v13 }
  0x58   :  { %480 = vmatpush.msra.mxu3 %v1708_v14  ;;  %421 = vmatpush.msra.mxu0 %v1711_v15 }
  0x59   :  { %457 = vmatpush.msra.mxu2 %v1721_v19  ;;  %441 = vmatpush.msra.mxu1 %v1713_v16 }
  0x5a   :  { %481 = vmatpush.msra.mxu3 %v1719_v18  ;;  %422 = vmatpush.msra.mxu0 %v1724_v20 }
  0x5b   :  { %458 = vmatpush.msra.mxu2 %v1733_v23  ;;  %442 = vmatpush.msra.mxu1 %v1726_v21 }
  0x5c   :  { %482 = vmatpush.msra.mxu3 %v1731_v22  ;;  %423 = vmatpush.msra.mxu0 %v1736_v24 }
  0x5d   :  { %459 = vmatpush.msra.mxu2 %v1745_v27  ;;  %443 = vmatpush.msra.mxu1 %v1738_v25 }
  0x5e   :  { %483 = vmatpush.msra.mxu3 %v1743_v26  ;;  %424 = vmatpush.msra.mxu0 %v1748_v28 }
  0x5f   :  { %460 = vmatpush.msra.mxu2 %v1757_v31  ;;  %444 = vmatpush.msra.mxu1 %v1750_v29 }
  0x60   :  { %484 = vmatpush.msra.mxu3 %v1755_v30  ;;  %425 = vmatpush.msra.mxu0 %v1760_v32 }
  0x61   :  { %461 = vmatpush.msra.mxu2 %v1769_v35  ;;  %445 = vmatpush.msra.mxu1 %v1762_v33 }
  0x62   :  { %485 = vmatpush.msra.mxu3 %v1767_v34  ;;  %426 = vmatpush.msra.mxu0 %v1772_v36 }
  0x63   :  { %462 = vmatpush.msra.mxu2 %v1781_v39  ;;  %446 = vmatpush.msra.mxu1 %v1774_v37 }
  0x64   :  { %486 = vmatpush.msra.mxu3 %v1779_v38  ;;  %427 = vmatpush.msra.mxu0 %v1784_v40 }
  0x65   :  { %463 = vmatpush.msra.mxu2 %v1793_v43  ;;  %447 = vmatpush.msra.mxu1 %v1786_v41 }
  0x66   :  { %487 = vmatpush.msra.mxu3 %v1791_v42  ;;  %428 = vmatpush.msra.mxu0 %v1796_v44 }
  0x67   :  { %464 = vmatpush.msra.mxu2 %v1805_v47  ;;  %448 = vmatpush.msra.mxu1 %v1798_v45 }
  0x68   :  { %488 = vmatpush.msra.mxu3 %v1803_v46  ;;  %429 = vmatpush.msra.mxu0 %v1808_v48 }
  0x69   :  { %465 = vmatpush.msra.mxu2 %v1817_v51  ;;  %449 = vmatpush.msra.mxu1 %v1810_v49 }
  0x6a   :  { %489 = vmatpush.msra.mxu3 %v1815_v50  ;;  %430 = vmatpush.msra.mxu0 %v1820_v52  ;;  %v108_v52 = vld [vmem:[#allocation2] sm:$0xff] }
  0x6b   :  { %466 = vmatpush.msra.mxu2 %v1829_v55  ;;  %450 = vmatpush.msra.mxu1 %v1822_v53  ;;  %v109_v53 = vld [vmem:[#allocation2 + $0x8] sm:$0xff] }
  0x6c   :  { %490 = vmatpush.msra.mxu3 %v1827_v54  ;;  %431 = vmatpush.msra.mxu0 %v1832_v56 }
  0x6d   :  { %467 = vmatpush.msra.mxu2 %v1845_v59  ;;  %451 = vmatpush.msra.mxu1 %v1834_v57  ;;  %v111_v57 = vld [vmem:[#allocation2 + $0x18] sm:$0xff] }
  0x6e   :  { %491 = vmatpush.msra.mxu3 %v1839_v58 }
  0x6f   :  { %468 = vmatpush.msra.mxu2 %v1848_v61 }
  0x71   :  { %469 = vmatpush.msra.mxu2 %v1852_v62 }
  0x73   :  { %470 = vmatpush.msra.mxu2 %v1858_v63 }
  0x75   :  { %471 = vmatpush.msra.mxu2 %v1864_v0  ;;  %v110_v0 = vld [vmem:[#allocation2 + $0x10] sm:$0xff] }
  0xa9   :  { %v129_v50 = vpop.f32.mrf.mxu0 }
  0xaa   :  { %v192_v54 = vadd.f32 %v129_v50, %v108_v52  ;;  %v149_v49 = vpop.f32.mrf.mxu1 }
  0xab   :  { %v193_v48 = vadd.f32 %v149_v49, %v109_v53 }
  0xac   :  { %v1342_v46 = vmul.f32 -1.442695, %v192_v54 }
  0xad   :  { %v1343_v56 = vmul.f32 -1.442695, %v193_v48 }
  0xae   :  { %1372 = vpow2.f32 %v1342_v46 }
  0xaf   :  { %1374 = vpow2.f32 %v1343_v56 }
  0xb0   :  { %v189_v58 = vpop.f32.mrf.mxu3 }
  0xb1   :  { %v195_v45 = vadd.f32 %v189_v58, %v111_v57 }
  0xb3   :  { %v1344_v61 = vmul.f32 -1.442695, %v195_v45 }
  0xb4   :  { %v1373_v44 = vpop.eup %1372 }
  0xb5   :  { %v1375_v62 = vpop.eup %1374  ;;  %v199_v42 = vadd.f32 1.0, %v1373_v44  ;;  %1376 = vpow2.f32 %v1344_v61 }
  0xb6   :  { %v218_v63 = vadd.f32 1.0, %v1375_v62 }
  0xb7   :  { %1378 = vrcp.f32 %v199_v42  ;;  %v211_v57 = vand.u32 2147483648, %v199_v42  ;;  %v209_v61 = vand.u32 2147483647, %v199_v42  ;;  %vm205_vm2 = vweird.f32 %v199_v42 }
  0xb8   :  { %1380 = vrcp.f32 %v218_v63  ;;  %v230_v58 = vand.u32 2147483648, %v218_v63  ;;  %v228_v41 = vand.u32 2147483647, %v218_v63  ;;  %vm224_vm3 = vweird.f32 %v218_v63 }
  0xb9   :  { %v169_v59 = vpop.f32.mrf.mxu2  ;;  %vm210_vm5 = vcmp.eq.f32.partialorder %v209_v61, 8.507059e+37  ;;  %v2612_v61 = vld [vmem:[#allocation17_spill] sm:$0xff] }
  0xba   :  { %v194_v52 = vadd.f32 %v169_v59, %v110_v0  ;;  %vm229_vm7 = vcmp.eq.f32.partialorder %v228_v41, 8.507059e+37 }
  0xbb   :  { %v1377_v50 = vpop.eup %1376 }
  0xbc   :  { %v238_v49 = vadd.f32 1.0, %v1377_v50  ;;  %v212_v50 = vor.u32 1.1754944e-38, %v211_v57 }
  0xbd   :  { %v1379_v53 = vpop.eup %1378 }
  0xbe   :  { %v1381_v48 = vpop.eup %1380  ;;  %v201_v46 = vmul.f32 %v1379_v53, %v199_v42  ;;  %1382 = vrcp.f32 %v238_v49  ;;  %vm206_vm0 = vweird.f32 %v1379_v53  ;;  %vm244_vm9 = vweird.f32 %v238_v49 }
  0xbf   :  { %v220_v54 = vmul.f32 %v1381_v48, %v218_v63  ;;  %1384 = vtanh.f32 %v194_v52  ;;  %vm225_vm1 = vweird.f32 %v1381_v48  ;;  %vm207_vm4 = vmor %vm205_vm2, %vm206_vm0  ;;  %v231_v52 = vor.u32 1.1754944e-38, %v230_v58 }
  0xc0   :  { %v202_v56 = vsub.f32 1.0, %v201_v46  ;;  %vm226_vm6 = vmor %vm224_vm3, %vm225_vm1  ;;  %v250_v63 = vand.u32 2147483648, %v238_v49  ;;  %v248_v57 = vand.u32 2147483647, %v238_v49 }
  0xc1   :  { %v221_v45 = vsub.f32 1.0, %v220_v54 }
  0xc2   :  { %v203_v44 = vmul.f32 %v1379_v53, %v202_v56  ;;  %vm249_vm11 = vcmp.eq.f32.partialorder %v248_v57, 8.507059e+37  ;;  %v2624_v57 = vld [vmem:[#allocation27_spill] sm:$0xff] }
  0xc3   :  { %v222_v62 = vmul.f32 %v1381_v48, %v221_v45 }
  0xc4   :  { %v1383_v40 = vpop.eup %1382  ;;  %v204_v38 = vadd.f32 %v1379_v53, %v203_v44 }
  0xc5   :  { %v1385_v0 = vpop.eup %1384  ;;  %v240_v59 = vmul.f32 %v1383_v40, %v238_v49  ;;  %v223_v55 = vadd.f32 %v1381_v48, %v222_v62  ;;  %vm245_vm8 = vweird.f32 %v1383_v40  ;;  %v2610_v49 = vld [vmem:[#allocation15_spill] sm:$0xff]  ;;  %v2613_v62 = vld [vmem:[#allocation33_spill] sm:$0xff] }
  0xc6   :  { %v208_v46 = vsel %vm207_vm4, %v1379_v53, %v204_v38  ;;  %vm246_vm10 = vmor %vm244_vm9, %vm245_vm8  ;;  %v251_v53 = vor.u32 1.1754944e-38, %v250_v63  ;;  %v2623_v63 = vld [vmem:[#allocation26_spill] sm:$0xff] }
  0xc7   :  { %v241_v54 = vsub.f32 1.0, %v240_v59  ;;  %v213_v56 = vsel %vm210_vm5, %v212_v50, %v208_v46  ;;  %v227_v37 = vsel %vm226_vm6, %v1381_v48, %v223_v55  ;;  %v2611_v48 = vld [vmem:[#allocation16_spill] sm:$0xff]  ;;  %v2615_v59 = vld [vmem:[#allocation19_spill] sm:$0xff]  ;;  %v2618_v46 = vld [vmem:[#allocation21_spill] sm:$0xff] }
  0xc8   :  { %v232_v45 = vsel %vm229_vm7, %v231_v52, %v227_v37  ;;  %v255_v36 = vmul.f32 %v1385_v0, %v213_v56  ;;  %v2607_v37 = vld [vmem:[#allocation13_spill] sm:$0xff]  ;;  %v2614_v0 = vld [vmem:[#allocation18_spill] sm:$0xff]  ;;  %v2616_v50 = vld [vmem:[#allocation20_spill] sm:$0xff] }
  0xc9   :  { %v254_v34 = vmul.f32 0.0, %v232_v45  ;;  %v242_v51 = vmul.f32 %v1383_v40, %v241_v54  ;;  %v2617_v52 = vld [vmem:[#allocation34_spill] sm:$0xff]  ;;  %v2620_v56 = vld [vmem:[#allocation23_spill] sm:$0xff] }
  0xca   :  { %v2619_v54 = vld [vmem:[#allocation22_spill] sm:$0xff]  ;;  %v2621_v45 = vld [vmem:[#allocation35_spill] sm:$0xff] }
  0xcb   :  { %v1989_v44 = vadd.f32 %v255_v36, %v254_v34  ;;  %v243_v42 = vadd.f32 %v1383_v40, %v242_v51  ;;  %v2605_v34 = vld [vmem:[#allocation25_spill] sm:$0xff]  ;;  %v2606_v36 = vld [vmem:[#allocation12_spill] sm:$0xff] }
  0xcc   :  { %v2609_v51 = vld [vmem:[#allocation29_spill] sm:$0xff] }
  0xcd   :  { %1386 = vtanh.f32 %v1989_v44  ;;  %v247_v38 = vsel %vm246_vm10, %v1383_v40, %v243_v42  ;;  %v2608_v40 = vld [vmem:[#allocation14_spill] sm:$0xff]  ;;  %v2622_v42 = vld [vmem:[#allocation24_spill] sm:$0xff] }
  0xce   :  { %v252_v55 = vsel %vm249_vm11, %v251_v53, %v247_v38  ;;  %v2625_v38 = vld [vmem:[#allocation36_spill] sm:$0xff] }
  0xcf   :  { %v2626_v53 = vld [vmem:[#allocation28_spill] sm:$0xff] }
  0xd3   :  { %v1387_v58 = vpop.eup %1386 }
  0xd4   :  { %v258_v41 = vmul.f32 %v1387_v58, %v252_v55  ;;  %v2627_v58 = vld [vmem:[#allocation30_spill] sm:$0xff]  ;;  %v2628_v55 = vld [vmem:[#allocation31_spill] sm:$0xff] }
  0xd6   :  { %280 = vmatmul.f32.vlgmr.msrb.gmra.mxu0 %v258_v41  ;;  %300 = vmatmul.f32.vlgmr.msrb.gmra.mxu1 %v258_v41 }
  0xd7   :  { %320 = vmatmul.f32.vlgmr.msrb.gmra.mxu2 %v258_v41  ;;  %340 = vmatmul.f32.vlgmr.msrb.gmra.mxu3 %v258_v41  ;;  %v2629_v41 = vld [vmem:[#allocation37_spill] sm:$0xff] }
  0xd8   :  { %568 = vmatpush.msrb.mxu0 %v2604_v60  ;;  %588 = vmatpush.msrb.mxu1 %v1671_v1 }
  0xd9   :  { %608 = vmatpush.msrb.mxu2 %v1715_v17  ;;  %628 = vmatpush.msrb.mxu3 %v1673_v2 }
  0xda   :  { %569 = vmatpush.msrb.mxu0 %v1677_v3  ;;  %589 = vmatpush.msrb.mxu1 %v1679_v4 }
  0xdb   :  { %609 = vmatpush.msrb.mxu2 %v1721_v19  ;;  %629 = vmatpush.msrb.mxu3 %v1681_v5 }
  0xdc   :  { %570 = vmatpush.msrb.mxu0 %v1684_v6  ;;  %590 = vmatpush.msrb.mxu1 %v1686_v7 }
  0xdd   :  { %610 = vmatpush.msrb.mxu2 %v1733_v23  ;;  %630 = vmatpush.msrb.mxu3 %v1690_v8 }
  0xde   :  { %571 = vmatpush.msrb.mxu0 %v1693_v9  ;;  %591 = vmatpush.msrb.mxu1 %v1695_v10 }
  0xdf   :  { %611 = vmatpush.msrb.mxu2 %v1745_v27  ;;  %631 = vmatpush.msrb.mxu3 %v1699_v11 }
  0xe0   :  { %572 = vmatpush.msrb.mxu0 %v1702_v12  ;;  %592 = vmatpush.msrb.mxu1 %v1704_v13 }
  0xe1   :  { %612 = vmatpush.msrb.mxu2 %v1757_v31  ;;  %632 = vmatpush.msrb.mxu3 %v1708_v14 }
  0xe2   :  { %573 = vmatpush.msrb.mxu0 %v1711_v15  ;;  %593 = vmatpush.msrb.mxu1 %v1713_v16 }
  0xe3   :  { %613 = vmatpush.msrb.mxu2 %v1769_v35  ;;  %633 = vmatpush.msrb.mxu3 %v1719_v18 }
  0xe4   :  { %574 = vmatpush.msrb.mxu0 %v1724_v20  ;;  %594 = vmatpush.msrb.mxu1 %v1726_v21 }
  0xe5   :  { %614 = vmatpush.msrb.mxu2 %v1781_v39  ;;  %634 = vmatpush.msrb.mxu3 %v1731_v22 }
  0xe6   :  { %575 = vmatpush.msrb.mxu0 %v1736_v24  ;;  %595 = vmatpush.msrb.mxu1 %v1738_v25 }
  0xe7   :  { %615 = vmatpush.msrb.mxu2 %v1793_v43  ;;  %635 = vmatpush.msrb.mxu3 %v1743_v26 }
  0xe8   :  { %576 = vmatpush.msrb.mxu0 %v1748_v28  ;;  %596 = vmatpush.msrb.mxu1 %v1750_v29 }
  0xe9   :  { %616 = vmatpush.msrb.mxu2 %v1805_v47  ;;  %636 = vmatpush.msrb.mxu3 %v1755_v30 }
  0xea   :  { %577 = vmatpush.msrb.mxu0 %v1760_v32  ;;  %597 = vmatpush.msrb.mxu1 %v1762_v33 }
  0xeb   :  { %617 = vmatpush.msrb.mxu2 %v2605_v34  ;;  %637 = vmatpush.msrb.mxu3 %v2606_v36 }
  0xec   :  { %578 = vmatpush.msrb.mxu0 %v2607_v37  ;;  %598 = vmatpush.msrb.mxu1 %v2608_v40 }
  0xed   :  { %618 = vmatpush.msrb.mxu2 %v2609_v51  ;;  %638 = vmatpush.msrb.mxu3 %v2610_v49 }
  0xee   :  { %579 = vmatpush.msrb.mxu0 %v2611_v48  ;;  %599 = vmatpush.msrb.mxu1 %v2612_v61 }
  0xef   :  { %619 = vmatpush.msrb.mxu2 %v2613_v62  ;;  %639 = vmatpush.msrb.mxu3 %v2614_v0 }
  0xf0   :  { %580 = vmatpush.msrb.mxu0 %v2615_v59  ;;  %600 = vmatpush.msrb.mxu1 %v2616_v50 }
  0xf1   :  { %620 = vmatpush.msrb.mxu2 %v2617_v52  ;;  %640 = vmatpush.msrb.mxu3 %v2618_v46 }
  0xf2   :  { %581 = vmatpush.msrb.mxu0 %v2619_v54  ;;  %601 = vmatpush.msrb.mxu1 %v2620_v56  ;;  %v2630_v54 = vld [vmem:[#allocation32_spill] sm:$0xff]  ;;  %v260_v56 = vld [vmem:[#allocation2 + $0x20] sm:$0xff] }
  0xf3   :  { %621 = vmatpush.msrb.mxu2 %v2621_v45  ;;  %641 = vmatpush.msrb.mxu3 %v2622_v42  ;;  %v261_v45 = vld [vmem:[#allocation2 + $0x28] sm:$0xff] }
  0xf4   :  { %582 = vmatpush.msrb.mxu0 %v2623_v63  ;;  %602 = vmatpush.msrb.mxu1 %v2624_v57 }
  0xf5   :  { %622 = vmatpush.msrb.mxu2 %v2625_v38  ;;  %642 = vmatpush.msrb.mxu3 %v2626_v53  ;;  %v263_v38 = vld [vmem:[#allocation2 + $0x38] sm:$0xff] }
  0xf6   :  { %583 = vmatpush.msrb.mxu0 %v2627_v58  ;;  %603 = vmatpush.msrb.mxu1 %v2628_v55 }
  0xf7   :  { %623 = vmatpush.msrb.mxu2 %v2629_v41  ;;  %643 = vmatpush.msrb.mxu3 %v2630_v54  ;;  %v262_v54 = vld [vmem:[#allocation2 + $0x30] sm:$0xff] }
 0x153   :  { %v281_v46 = vpop.f32.mrf.mxu0  ;;  %v301_v42 = vpop.f32.mrf.mxu1 }
 0x154   :  { %v344_v52 = vadd.f32 %v281_v46, %v260_v56  ;;  %v345_v63 = vadd.f32 %v301_v42, %v261_v45 }
 0x156   :  { %v1345_v50 = vmul.f32 -1.442695, %v344_v52  ;;  %v1346_v57 = vmul.f32 -1.442695, %v345_v63 }
 0x158   :  { %1388 = vpow2.f32 %v1345_v50 }
 0x159   :  { %1390 = vpow2.f32 %v1346_v57 }
 0x15a   :  { %v341_v53 = vpop.f32.mrf.mxu3  ;;  %v321_v61 = vpop.f32.mrf.mxu2 }
 0x15b   :  { %v347_v59 = vadd.f32 %v341_v53, %v263_v38  ;;  %v346_v52 = vadd.f32 %v321_v61, %v262_v54 }
 0x15d   :  { %v1347_v58 = vmul.f32 -1.442695, %v347_v59 }
 0x15e   :  { %v1389_v0 = vpop.eup %1388 }
 0x15f   :  { %v1391_v55 = vpop.eup %1390  ;;  %v351_v62 = vadd.f32 1.0, %v1389_v0  ;;  %1392 = vpow2.f32 %v1347_v58 }
 0x160   :  { %v370_v41 = vadd.f32 1.0, %v1391_v55 }
 0x161   :  { %1394 = vrcp.f32 %v351_v62  ;;  %v363_v59 = vand.u32 2147483648, %v351_v62  ;;  %v361_v53 = vand.u32 2147483647, %v351_v62  ;;  %vm357_vm14 = vweird.f32 %v351_v62 }
 0x162   :  { %1396 = vrcp.f32 %v370_v41  ;;  %v382_v38 = vand.u32 2147483648, %v370_v41  ;;  %v380_v55 = vand.u32 2147483647, %v370_v41  ;;  %vm376_vm15 = vweird.f32 %v370_v41 }
 0x163   :  { %vm362_vm2 = vcmp.eq.f32.partialorder %v361_v53, 8.507059e+37 }
 0x164   :  { %vm381_vm3 = vcmp.eq.f32.partialorder %v380_v55, 8.507059e+37 }
 0x165   :  { %v1393_v48 = vpop.eup %1392 }
 0x166   :  { %v390_v46 = vadd.f32 1.0, %v1393_v48  ;;  %v364_v48 = vor.u32 1.1754944e-38, %v363_v59 }
 0x167   :  { %v1395_v56 = vpop.eup %1394 }
 0x168   :  { %v1397_v45 = vpop.eup %1396  ;;  %v353_v50 = vmul.f32 %v1395_v56, %v351_v62  ;;  %1398 = vrcp.f32 %v390_v46  ;;  %vm358_vm12 = vweird.f32 %v1395_v56  ;;  %v402_v59 = vand.u32 2147483648, %v390_v46 }
 0x169   :  { %v372_v42 = vmul.f32 %v1397_v45, %v370_v41  ;;  %1400 = vtanh.f32 %v346_v52  ;;  %vm377_vm13 = vweird.f32 %v1397_v45  ;;  %vm359_vm0 = vmor %vm357_vm14, %vm358_vm12  ;;  %vm396_vm5 = vweird.f32 %v390_v46 }
 0x16a   :  { %v354_v63 = vsub.f32 1.0, %v353_v50  ;;  %vm378_vm1 = vmor %vm376_vm15, %vm377_vm13  ;;  %v383_v50 = vor.u32 1.1754944e-38, %v382_v38  ;;  %v403_v38 = vor.u32 1.1754944e-38, %v402_v59 }
 0x16b   :  { %v373_v57 = vsub.f32 1.0, %v372_v42 }
 0x16c   :  { %v355_v0 = vmul.f32 %v1395_v56, %v354_v63 }
 0x16d   :  { %v374_v58 = vmul.f32 %v1397_v45, %v373_v57 }
 0x16e   :  { %v1399_v49 = vpop.eup %1398  ;;  %v356_v51 = vadd.f32 %v1395_v56, %v355_v0 }
 0x16f   :  { %v375_v61 = vadd.f32 %v1397_v45, %v374_v58  ;;  %v392_v54 = vmul.f32 %v1399_v49, %v390_v46  ;;  %v1401_v52 = vpop.eup %1400  ;;  %vm397_vm4 = vweird.f32 %v1399_v49 }
 0x170   :  { %v360_v42 = vsel %vm359_vm0, %v1395_v56, %v356_v51  ;;  %v400_v51 = vand.u32 2147483647, %v390_v46  ;;  %vm398_vm6 = vmor %vm396_vm5, %vm397_vm4 }
 0x171   :  { %v365_v40 = vsel %vm362_vm2, %v364_v48, %v360_v42  ;;  %v379_v63 = vsel %vm378_vm1, %v1397_v45, %v375_v61  ;;  %v393_v37 = vsub.f32 1.0, %v392_v54 }
 0x172   :  { %v384_v57 = vsel %vm381_vm3, %v383_v50, %v379_v63  ;;  %v407_v36 = vmul.f32 %v1401_v52, %v365_v40  ;;  %vm401_vm7 = vcmp.eq.f32.partialorder %v400_v51, 8.507059e+37  ;;  %v414_v40 = vld [vmem:[#allocation2 + $0x50] sm:$0xff] }
 0x173   :  { %v406_v34 = vmul.f32 %v384_v57, %v1989_v44  ;;  %v394_v0 = vmul.f32 %v1399_v49, %v393_v37 }
 0x175   :  { %v2057_v62 = vadd.f32 %v407_v36, %v406_v34  ;;  %v395_v41 = vadd.f32 %v1399_v49, %v394_v0 }
 0x177   :  { %1402 = vtanh.f32 %v2057_v62  ;;  %v399_v56 = vsel %vm398_vm6, %v1399_v49, %v395_v41 }
 0x178   :  { %v404_v53 = vsel %vm401_vm7, %v403_v38, %v399_v56 }
 0x17d   :  { %v1403_v45 = vpop.eup %1402 }
 0x17e   :  { %v410_v58 = vmul.f32 %v1403_v45, %v404_v53 }
 0x180   :  { %432 = vmatmul.f32.vlgmr.msra.gmra.mxu0 %v410_v58  ;;  %452 = vmatmul.f32.vlgmr.msra.gmra.mxu1 %v410_v58 }
 0x181   :  { %472 = vmatmul.f32.vlgmr.msra.gmra.mxu2 %v410_v58  ;;  %492 = vmatmul.f32.vlgmr.msra.gmra.mxu3 %v410_v58 }
 0x182   :  { %720 = vmatpush.msra.mxu0 %v2604_v60  ;;  %740 = vmatpush.msra.mxu1 %v1671_v1  ;;  %v2631_v1 = vld [vmem:[#allocation25_spill] sm:$0xff] }
 0x183   :  { %760 = vmatpush.msra.mxu2 %v1715_v17  ;;  %780 = vmatpush.msra.mxu3 %v1673_v2  ;;  %v2632_v2 = vld [vmem:[#allocation12_spill] sm:$0xff]  ;;  %v2647_v17 = vld [vmem:[#allocation35_spill] sm:$0xff] }
 0x184   :  { %721 = vmatpush.msra.mxu0 %v1677_v3  ;;  %741 = vmatpush.msra.mxu1 %v1679_v4  ;;  %v2633_v3 = vld [vmem:[#allocation13_spill] sm:$0xff]  ;;  %v2634_v4 = vld [vmem:[#allocation14_spill] sm:$0xff] }
 0x185   :  { %761 = vmatpush.msra.mxu2 %v1721_v19  ;;  %781 = vmatpush.msra.mxu3 %v1681_v5  ;;  %v2635_v5 = vld [vmem:[#allocation29_spill] sm:$0xff]  ;;  %v2649_v19 = vld [vmem:[#allocation26_spill] sm:$0xff] }
 0x186   :  { %722 = vmatpush.msra.mxu0 %v1684_v6  ;;  %742 = vmatpush.msra.mxu1 %v1686_v7  ;;  %v2636_v6 = vld [vmem:[#allocation15_spill] sm:$0xff]  ;;  %v2637_v7 = vld [vmem:[#allocation16_spill] sm:$0xff] }
 0x187   :  { %762 = vmatpush.msra.mxu2 %v1733_v23  ;;  %782 = vmatpush.msra.mxu3 %v1690_v8  ;;  %v2638_v8 = vld [vmem:[#allocation17_spill] sm:$0xff]  ;;  %v2653_v23 = vld [vmem:[#allocation30_spill] sm:$0xff] }
 0x188   :  { %723 = vmatpush.msra.mxu0 %v1693_v9  ;;  %743 = vmatpush.msra.mxu1 %v1695_v10  ;;  %v2639_v9 = vld [vmem:[#allocation33_spill] sm:$0xff]  ;;  %v2640_v10 = vld [vmem:[#allocation18_spill] sm:$0xff] }
 0x189   :  { %763 = vmatpush.msra.mxu2 %v1745_v27  ;;  %783 = vmatpush.msra.mxu3 %v1699_v11  ;;  %v2641_v11 = vld [vmem:[#allocation19_spill] sm:$0xff]  ;;  %v412_v27 = vld [vmem:[#allocation2 + $0x40] sm:$0xff] }
 0x18a   :  { %724 = vmatpush.msra.mxu0 %v1702_v12  ;;  %744 = vmatpush.msra.mxu1 %v1704_v13  ;;  %v2642_v12 = vld [vmem:[#allocation20_spill] sm:$0xff]  ;;  %v2643_v13 = vld [vmem:[#allocation34_spill] sm:$0xff] }
 0x18b   :  { %764 = vmatpush.msra.mxu2 %v1757_v31  ;;  %784 = vmatpush.msra.mxu3 %v1708_v14  ;;  %v2644_v14 = vld [vmem:[#allocation21_spill] sm:$0xff] }
 0x18c   :  { %725 = vmatpush.msra.mxu0 %v1711_v15  ;;  %745 = vmatpush.msra.mxu1 %v1713_v16  ;;  %v2645_v15 = vld [vmem:[#allocation22_spill] sm:$0xff]  ;;  %v2646_v16 = vld [vmem:[#allocation23_spill] sm:$0xff] }
 0x18d   :  { %765 = vmatpush.msra.mxu2 %v1769_v35  ;;  %785 = vmatpush.msra.mxu3 %v1719_v18  ;;  %v2648_v18 = vld [vmem:[#allocation24_spill] sm:$0xff] }
 0x18e   :  { %726 = vmatpush.msra.mxu0 %v1724_v20  ;;  %746 = vmatpush.msra.mxu1 %v1726_v21  ;;  %v2650_v20 = vld [vmem:[#allocation27_spill] sm:$0xff]  ;;  %v2651_v21 = vld [vmem:[#allocation36_spill] sm:$0xff] }
 0x18f   :  { %766 = vmatpush.msra.mxu2 %v1781_v39  ;;  %786 = vmatpush.msra.mxu3 %v1731_v22  ;;  %v2652_v22 = vld [vmem:[#allocation28_spill] sm:$0xff]  ;;  %v415_v39 = vld [vmem:[#allocation2 + $0x58] sm:$0xff] }
 0x190   :  { %727 = vmatpush.msra.mxu0 %v1736_v24  ;;  %747 = vmatpush.msra.mxu1 %v1738_v25  ;;  %v2654_v24 = vld [vmem:[#allocation31_spill] sm:$0xff]  ;;  %v2655_v25 = vld [vmem:[#allocation37_spill] sm:$0xff] }
 0x191   :  { %767 = vmatpush.msra.mxu2 %v1793_v43  ;;  %787 = vmatpush.msra.mxu3 %v1743_v26  ;;  %v2656_v26 = vld [vmem:[#allocation32_spill] sm:$0xff] }
 0x192   :  { %728 = vmatpush.msra.mxu0 %v1748_v28  ;;  %748 = vmatpush.msra.mxu1 %v1750_v29  ;;  %v413_v28 = vld [vmem:[#allocation2 + $0x48] sm:$0xff] }
 0x193   :  { %768 = vmatpush.msra.mxu2 %v1805_v47  ;;  %788 = vmatpush.msra.mxu3 %v1755_v30 }
 0x194   :  { %729 = vmatpush.msra.mxu0 %v1760_v32  ;;  %749 = vmatpush.msra.mxu1 %v1762_v33 }
 0x195   :  { %769 = vmatpush.msra.mxu2 %v2631_v1  ;;  %789 = vmatpush.msra.mxu3 %v2632_v2 }
 0x196   :  { %730 = vmatpush.msra.mxu0 %v2633_v3  ;;  %750 = vmatpush.msra.mxu1 %v2634_v4 }
 0x197   :  { %770 = vmatpush.msra.mxu2 %v2635_v5  ;;  %790 = vmatpush.msra.mxu3 %v2636_v6 }
 0x198   :  { %731 = vmatpush.msra.mxu0 %v2637_v7  ;;  %751 = vmatpush.msra.mxu1 %v2638_v8 }
 0x199   :  { %771 = vmatpush.msra.mxu2 %v2639_v9  ;;  %791 = vmatpush.msra.mxu3 %v2640_v10 }
 0x19a   :  { %732 = vmatpush.msra.mxu0 %v2641_v11  ;;  %752 = vmatpush.msra.mxu1 %v2642_v12 }
 0x19b   :  { %772 = vmatpush.msra.mxu2 %v2643_v13  ;;  %792 = vmatpush.msra.mxu3 %v2644_v14 }
 0x19c   :  { %733 = vmatpush.msra.mxu0 %v2645_v15  ;;  %753 = vmatpush.msra.mxu1 %v2646_v16 }
 0x19d   :  { %773 = vmatpush.msra.mxu2 %v2647_v17  ;;  %793 = vmatpush.msra.mxu3 %v2648_v18 }
 0x19e   :  { %734 = vmatpush.msra.mxu0 %v2649_v19  ;;  %754 = vmatpush.msra.mxu1 %v2650_v20 }
 0x19f   :  { %774 = vmatpush.msra.mxu2 %v2651_v21  ;;  %794 = vmatpush.msra.mxu3 %v2652_v22  ;;  %v2131_v21 = vld [vmem:[#allocation5 + $0x1e8] sm:$0xff]  ;;  %v2134_v22 = vld [vmem:[#allocation5 + $0x1f0] sm:$0xff] }
 0x1a0   :  { %735 = vmatpush.msra.mxu0 %v2653_v23  ;;  %755 = vmatpush.msra.mxu1 %v2654_v24  ;;  %v2137_v23 = vld [vmem:[#allocation5 + $0x1f8] sm:$0xff]  ;;  %v2140_v24 = vld [vmem:[#allocation5 + $0x1c0] sm:$0xff] }
 0x1a1   :  { %775 = vmatpush.msra.mxu2 %v2655_v25  ;;  %795 = vmatpush.msra.mxu3 %v2656_v26  ;;  %v2143_v25 = vld [vmem:[#allocation5 + $0x1c8] sm:$0xff]  ;;  %v2146_v26 = vld [vmem:[#allocation5 + $0x1d0] sm:$0xff] }
 0x1fd   :  { %v433_v29 = vpop.f32.mrf.mxu0  ;;  %v453_v30 = vpop.f32.mrf.mxu1 }
 0x1fe   :  { %v496_v31 = vadd.f32 %v433_v29, %v412_v27  ;;  %v497_v32 = vadd.f32 %v453_v30, %v413_v28  ;;  %v2149_v27 = vld [vmem:[#allocation5 + $0x1d8] sm:$0xff]  ;;  %v2152_v28 = vld [vmem:[#allocation5 + $0x1a0] sm:$0xff]  ;;  %v2155_v29 = vld [vmem:[#allocation5 + $0x1a8] sm:$0xff] }
 0x1ff   :  { %v2158_v30 = vld [vmem:[#allocation5 + $0x1b0] sm:$0xff] }
 0x200   :  { %v1348_v33 = vmul.f32 -1.442695, %v496_v31  ;;  %v1349_v35 = vmul.f32 -1.442695, %v497_v32  ;;  %v2161_v31 = vld [vmem:[#allocation5 + $0x1b8] sm:$0xff]  ;;  %v2164_v32 = vld [vmem:[#allocation5 + $0x180] sm:$0xff] }
 0x202   :  { %1404 = vpow2.f32 %v1348_v33  ;;  %v2167_v33 = vld [vmem:[#allocation5 + $0x188] sm:$0xff] }
 0x203   :  { %1406 = vpow2.f32 %v1349_v35  ;;  %v2170_v35 = vld [vmem:[#allocation5 + $0x190] sm:$0xff] }
 0x204   :  { %v493_v43 = vpop.f32.mrf.mxu3  ;;  %v473_v49 = vpop.f32.mrf.mxu2 }
 0x205   :  { %v499_v47 = vadd.f32 %v493_v43, %v415_v39  ;;  %v498_v61 = vadd.f32 %v473_v49, %v414_v40  ;;  %v2173_v39 = vld [vmem:[#allocation5 + $0x198] sm:$0xff]  ;;  %v2176_v43 = vld [vmem:[#allocation5 + $0x160] sm:$0xff] }
 0x206   :  { %v2197_v40 = vld [vmem:[#allocation5 + $0x158] sm:$0xff]  ;;  %v2200_v49 = vld [vmem:[#allocation5 + $0x120] sm:$0xff] }
 0x207   :  { %v1350_v60 = vmul.f32 -1.442695, %v499_v47  ;;  %v2179_v47 = vld [vmem:[#allocation5 + $0x168] sm:$0xff] }
 0x208   :  { %v1405_v44 = vpop.eup %1404 }
 0x209   :  { %v1407_v34 = vpop.eup %1406  ;;  %v503_v36 = vadd.f32 1.0, %v1405_v44  ;;  %1408 = vpow2.f32 %v1350_v60  ;;  %v2182_v60 = vld [vmem:[#allocation5 + $0x170] sm:$0xff]  ;;  %v2185_v44 = vld [vmem:[#allocation5 + $0x178] sm:$0xff] }
 0x20a   :  { %v522_v37 = vadd.f32 1.0, %v1407_v34  ;;  %v2188_v34 = vld [vmem:[#allocation5 + $0x140] sm:$0xff] }
 0x20b   :  { %1410 = vrcp.f32 %v503_v36  ;;  %v515_v57 = vand.u32 2147483648, %v503_v36  ;;  %v513_v59 = vand.u32 2147483647, %v503_v36  ;;  %vm509_vm10 = vweird.f32 %v503_v36 }
 0x20c   :  { %1412 = vrcp.f32 %v522_v37  ;;  %v534_v0 = vand.u32 2147483648, %v522_v37  ;;  %v532_v56 = vand.u32 2147483647, %v522_v37  ;;  %vm528_vm11 = vweird.f32 %v522_v37 }
 0x20d   :  { %v516_v53 = vor.u32 1.1754944e-38, %v515_v57  ;;  %vm514_vm14 = vcmp.eq.f32.partialorder %v513_v59, 8.507059e+37  ;;  %v2230_v57 = vld [vmem:[#allocation5 + $0xf0] sm:$0xff]  ;;  %v2239_v59 = vld [vmem:[#allocation5 + $0xc8] sm:$0xff] }
 0x20e   :  { %v535_v2 = vor.u32 1.1754944e-38, %v534_v0  ;;  %vm533_vm15 = vcmp.eq.f32.partialorder %v532_v56, 8.507059e+37  ;;  %v2233_v0 = vld [vmem:[#allocation5 + $0xf8] sm:$0xff] }
 0x20f   :  { %v1409_v46 = vpop.eup %1408  ;;  %v2245_v56 = vld [vmem:[#allocation5 + $0xd8] sm:$0xff] }
 0x210   :  { %v542_v55 = vadd.f32 1.0, %v1409_v46  ;;  %v2203_v46 = vld [vmem:[#allocation5 + $0x128] sm:$0xff]  ;;  %2658 = vst [vmem:[#allocation25_spill] sm:$0xff] %v2245_v56 }
 0x211   :  { %v1411_v48 = vpop.eup %1410 }
 0x212   :  { %v1413_v54 = vpop.eup %1412  ;;  %v505_v50 = vmul.f32 %v1411_v48, %v503_v36  ;;  %1414 = vrcp.f32 %v542_v55  ;;  %vm510_vm8 = vweird.f32 %v1411_v48  ;;  %v554_v14 = vand.u32 2147483648, %v542_v55  ;;  %v2191_v36 = vld [vmem:[#allocation5 + $0x148] sm:$0xff] }
 0x213   :  { %v524_v42 = vmul.f32 %v1413_v54, %v522_v37  ;;  %1416 = vtanh.f32 %v498_v61  ;;  %vm529_vm9 = vweird.f32 %v1413_v54  ;;  %vm511_vm12 = vmor %vm509_vm10, %vm510_vm8  ;;  %vm548_vm1 = vweird.f32 %v542_v55  ;;  %v2194_v37 = vld [vmem:[#allocation5 + $0x150] sm:$0xff]  ;;  %v2212_v61 = vld [vmem:[#allocation5 + $0x100] sm:$0xff] }
 0x214   :  { %v506_v52 = vsub.f32 1.0, %v505_v50  ;;  %vm530_vm13 = vmor %vm528_vm11, %vm529_vm9  ;;  %v552_v15 = vand.u32 2147483647, %v542_v55  ;;  %v555_v17 = vor.u32 1.1754944e-38, %v554_v14  ;;  %v2218_v50 = vld [vmem:[#allocation5 + $0x110] sm:$0xff]  ;;  %v2296_v14 = vld [vmem:[#allocation5 + $0x20] sm:$0xff] }
 0x215   :  { %v525_v63 = vsub.f32 1.0, %v524_v42  ;;  %v2221_v42 = vld [vmem:[#allocation5 + $0x118] sm:$0xff]  ;;  %2675 = vst [vmem:[#allocation24_spill] sm:$0xff] %v2296_v14 }
 0x216   :  { %v507_v41 = vmul.f32 %v1411_v48, %v506_v52  ;;  %vm553_vm3 = vcmp.eq.f32.partialorder %v552_v15, 8.507059e+37  ;;  %v2224_v52 = vld [vmem:[#allocation5 + $0xe0] sm:$0xff]  ;;  %v2299_v15 = vld [vmem:[#allocation5 + $0x28] sm:$0xff] }
 0x217   :  { %v526_v51 = vmul.f32 %v1413_v54, %v525_v63  ;;  %v2227_v63 = vld [vmem:[#allocation5 + $0xe8] sm:$0xff]  ;;  %2676 = vst [vmem:[#allocation26_spill] sm:$0xff] %v2299_v15 }
 0x218   :  { %v1415_v38 = vpop.eup %1414  ;;  %v508_v45 = vadd.f32 %v1411_v48, %v507_v41  ;;  %v2236_v41 = vld [vmem:[#allocation5 + $0xc0] sm:$0xff] }
 0x219   :  { %v527_v58 = vadd.f32 %v1413_v54, %v526_v51  ;;  %v544_v1 = vmul.f32 %v1415_v38, %v542_v55  ;;  %v1417_v4 = vpop.eup %1416  ;;  %vm549_vm0 = vweird.f32 %v1415_v38  ;;  %v2206_v55 = vld [vmem:[#allocation5 + $0x130] sm:$0xff] }
 0x21a   :  { %v512_v3 = vsel %vm511_vm12, %v1411_v48, %v508_v45  ;;  %vm550_vm2 = vmor %vm548_vm1, %vm549_vm0  ;;  %v2209_v48 = vld [vmem:[#allocation5 + $0x138] sm:$0xff]  ;;  %v2242_v51 = vld [vmem:[#allocation5 + $0xd0] sm:$0xff] }
 0x21b   :  { %v517_v5 = vsel %vm514_vm14, %v516_v53, %v512_v3  ;;  %v531_v6 = vsel %vm530_vm13, %v1413_v54, %v527_v58  ;;  %v545_v7 = vsub.f32 1.0, %v544_v1  ;;  %v2215_v54 = vld [vmem:[#allocation5 + $0x108] sm:$0xff]  ;;  %2657 = vst [vmem:[#allocation11_spill] sm:$0xff] %v2242_v51  ;;  %v2254_v53 = vld [vmem:[#allocation5 + $0xb0] sm:$0xff]  ;;  %v2257_v58 = vld [vmem:[#allocation5 + $0xb8] sm:$0xff] }
 0x21c   :  { %v536_v8 = vsel %vm533_vm15, %v535_v2, %v531_v6  ;;  %v559_v9 = vmul.f32 %v1417_v4, %v517_v5  ;;  %v2251_v45 = vld [vmem:[#allocation5 + $0xa8] sm:$0xff]  ;;  %2661 = vst [vmem:[#allocation14_spill] sm:$0xff] %v2254_v53  ;;  %v2260_v1 = vld [vmem:[#allocation5 + $0x80] sm:$0xff]  ;;  %v2266_v3 = vld [vmem:[#allocation5 + $0x90] sm:$0xff] }
 0x21d   :  { %v558_v10 = vmul.f32 %v536_v8, %v2057_v62  ;;  %v546_v11 = vmul.f32 %v1415_v38, %v545_v7  ;;  %v2128_v62 = vld [vmem:[#allocation5 + $0x1e0] sm:$0xff]  ;;  %2660 = vst [vmem:[#allocation13_spill] sm:$0xff] %v2251_v45  ;;  %v2263_v2 = vld [vmem:[#allocation5 + $0x88] sm:$0xff]  ;;  %v2269_v4 = vld [vmem:[#allocation5 + $0x98] sm:$0xff] }
 0x21e   :  { %2662 = vst [vmem:[#allocation29_spill] sm:$0xff] %v2257_v58  ;;  %v2272_v5 = vld [vmem:[#allocation5 + $0x60] sm:$0xff]  ;;  %v2275_v6 = vld [vmem:[#allocation5 + $0x68] sm:$0xff]  ;;  %v2278_v7 = vld [vmem:[#allocation5 + $0x70] sm:$0xff] }
 0x21f   :  { %v2125_v12 = vadd.f32 %v559_v9, %v558_v10  ;;  %v547_v13 = vadd.f32 %v1415_v38, %v546_v11  ;;  %2663 = vst [vmem:[#allocation15_spill] sm:$0xff] %v2260_v1  ;;  %v2281_v8 = vld [vmem:[#allocation5 + $0x78] sm:$0xff]  ;;  %v2284_v9 = vld [vmem:[#allocation5 + $0x40] sm:$0xff]  ;;  %v2287_v10 = vld [vmem:[#allocation5 + $0x48] sm:$0xff] }
 0x220   :  { %2664 = vst [vmem:[#allocation16_spill] sm:$0xff] %v2263_v2  ;;  %v2290_v11 = vld [vmem:[#allocation5 + $0x50] sm:$0xff] }
 0x221   :  { %1418 = vtanh.f32 %v2125_v12  ;;  %v551_v16 = vsel %vm550_vm2, %v1415_v38, %v547_v13  ;;  %v2248_v38 = vld [vmem:[#allocation5 + $0xa0] sm:$0xff]  ;;  %2665 = vst [vmem:[#allocation17_spill] sm:$0xff] %v2266_v3  ;;  %v2293_v13 = vld [vmem:[#allocation5 + $0x58] sm:$0xff] }
 0x222   :  { %v556_v19 = vsel %vm553_vm3, %v555_v17, %v551_v16  ;;  %2659 = vst [vmem:[#allocation12_spill] sm:$0xff] %v2248_v38  ;;  %v2302_v16 = vld [vmem:[#allocation5 + $0x30] sm:$0xff]  ;;  %v2305_v17 = vld [vmem:[#allocation5 + $0x38] sm:$0xff] }
 0x223   :  { %2666 = vst [vmem:[#allocation33_spill] sm:$0xff] %v2269_v4 }
 0x224   :  { %2667 = vst [vmem:[#allocation18_spill] sm:$0xff] %v2272_v5 }
 0x225   :  { %2668 = vst [vmem:[#allocation19_spill] sm:$0xff] %v2275_v6 }
 0x226   :  { %2669 = vst [vmem:[#allocation20_spill] sm:$0xff] %v2278_v7 }
 0x227   :  { %v1419_v18 = vpop.eup %1418  ;;  %2670 = vst [vmem:[#allocation34_spill] sm:$0xff] %v2281_v8 }
 0x228   :  { %v562_v20 = vmul.f32 %v1419_v18, %v556_v19  ;;  %2671 = vst [vmem:[#allocation21_spill] sm:$0xff] %v2284_v9  ;;  %v2308_v18 = vld [vmem:[#allocation5] sm:$0xff]  ;;  %v2311_v19 = vld [vmem:[#allocation5 + $0x8] sm:$0xff] }
 0x229   :  { %2672 = vst [vmem:[#allocation22_spill] sm:$0xff] %v2287_v10 }
 0x22a   :  { %584 = vmatmul.f32.vlgmr.msrb.gmra.mxu0 %v562_v20  ;;  %604 = vmatmul.f32.vlgmr.msrb.gmra.mxu1 %v562_v20  ;;  %2673 = vst [vmem:[#allocation23_spill] sm:$0xff] %v2290_v11 }
 0x22b   :  { %624 = vmatmul.f32.vlgmr.msrb.gmra.mxu2 %v562_v20  ;;  %644 = vmatmul.f32.vlgmr.msrb.gmra.mxu3 %v562_v20  ;;  %2674 = vst [vmem:[#allocation35_spill] sm:$0xff] %v2293_v13  ;;  %v2314_v20 = vld [vmem:[#allocation5 + $0x10] sm:$0xff] }
 0x22c   :  { %872 = vmatpush.msrb.mxu0 %v2128_v62  ;;  %892 = vmatpush.msrb.mxu1 %v2131_v21  ;;  %2677 = vst [vmem:[#allocation27_spill] sm:$0xff] %v2302_v16 }
 0x22d   :  { %912 = vmatpush.msrb.mxu2 %v2134_v22  ;;  %932 = vmatpush.msrb.mxu3 %v2137_v23  ;;  %2678 = vst [vmem:[#allocation36_spill] sm:$0xff] %v2305_v17 }
 0x22e   :  { %873 = vmatpush.msrb.mxu0 %v2140_v24  ;;  %893 = vmatpush.msrb.mxu1 %v2143_v25  ;;  %2679 = vst [vmem:[#allocation28_spill] sm:$0xff] %v2308_v18 }
 0x22f   :  { %913 = vmatpush.msrb.mxu2 %v2146_v26  ;;  %933 = vmatpush.msrb.mxu3 %v2149_v27  ;;  %2680 = vst [vmem:[#allocation30_spill] sm:$0xff] %v2311_v19 }
 0x230   :  { %874 = vmatpush.msrb.mxu0 %v2152_v28  ;;  %894 = vmatpush.msrb.mxu1 %v2155_v29  ;;  %2681 = vst [vmem:[#allocation31_spill] sm:$0xff] %v2314_v20 }
 0x231   :  { %914 = vmatpush.msrb.mxu2 %v2158_v30  ;;  %934 = vmatpush.msrb.mxu3 %v2161_v31 }
 0x232   :  { %875 = vmatpush.msrb.mxu0 %v2164_v32  ;;  %895 = vmatpush.msrb.mxu1 %v2167_v33 }
 0x233   :  { %915 = vmatpush.msrb.mxu2 %v2170_v35  ;;  %935 = vmatpush.msrb.mxu3 %v2173_v39 }
 0x234   :  { %876 = vmatpush.msrb.mxu0 %v2176_v43  ;;  %896 = vmatpush.msrb.mxu1 %v2179_v47 }
 0x235   :  { %916 = vmatpush.msrb.mxu2 %v2182_v60  ;;  %936 = vmatpush.msrb.mxu3 %v2185_v44 }
 0x236   :  { %877 = vmatpush.msrb.mxu0 %v2188_v34  ;;  %897 = vmatpush.msrb.mxu1 %v2191_v36 }
 0x237   :  { %917 = vmatpush.msrb.mxu2 %v2194_v37  ;;  %937 = vmatpush.msrb.mxu3 %v2197_v40 }
 0x238   :  { %878 = vmatpush.msrb.mxu0 %v2200_v49  ;;  %898 = vmatpush.msrb.mxu1 %v2203_v46 }
 0x239   :  { %918 = vmatpush.msrb.mxu2 %v2206_v55  ;;  %938 = vmatpush.msrb.mxu3 %v2209_v48 }
 0x23a   :  { %879 = vmatpush.msrb.mxu0 %v2212_v61  ;;  %899 = vmatpush.msrb.mxu1 %v2215_v54 }
 0x23b   :  { %919 = vmatpush.msrb.mxu2 %v2218_v50  ;;  %939 = vmatpush.msrb.mxu3 %v2221_v42 }
 0x23c   :  { %880 = vmatpush.msrb.mxu0 %v2224_v52  ;;  %900 = vmatpush.msrb.mxu1 %v2227_v63 }
 0x23d   :  { %920 = vmatpush.msrb.mxu2 %v2230_v57  ;;  %940 = vmatpush.msrb.mxu3 %v2233_v0 }
 0x23e   :  { %881 = vmatpush.msrb.mxu0 %v2236_v41  ;;  %901 = vmatpush.msrb.mxu1 %v2239_v59 }
 0x23f   :  { %921 = vmatpush.msrb.mxu2 %v2242_v51  ;;  %941 = vmatpush.msrb.mxu3 %v2245_v56 }
 0x240   :  { %882 = vmatpush.msrb.mxu0 %v2248_v38  ;;  %902 = vmatpush.msrb.mxu1 %v2251_v45 }
 0x241   :  { %922 = vmatpush.msrb.mxu2 %v2254_v53  ;;  %942 = vmatpush.msrb.mxu3 %v2257_v58 }
 0x242   :  { %883 = vmatpush.msrb.mxu0 %v2260_v1  ;;  %903 = vmatpush.msrb.mxu1 %v2263_v2 }
 0x243   :  { %923 = vmatpush.msrb.mxu2 %v2266_v3  ;;  %943 = vmatpush.msrb.mxu3 %v2269_v4 }
 0x244   :  { %884 = vmatpush.msrb.mxu0 %v2272_v5  ;;  %904 = vmatpush.msrb.mxu1 %v2275_v6 }
 0x245   :  { %924 = vmatpush.msrb.mxu2 %v2278_v7  ;;  %944 = vmatpush.msrb.mxu3 %v2281_v8  ;;  %v567_v8 = vld [vmem:[#allocation2 + $0x78] sm:$0xff] }
 0x246   :  { %885 = vmatpush.msrb.mxu0 %v2284_v9  ;;  %905 = vmatpush.msrb.mxu1 %v2287_v10 }
 0x247   :  { %925 = vmatpush.msrb.mxu2 %v2290_v11  ;;  %945 = vmatpush.msrb.mxu3 %v2293_v13 }
 0x248   :  { %886 = vmatpush.msrb.mxu0 %v2296_v14  ;;  %906 = vmatpush.msrb.mxu1 %v2299_v15  ;;  %v2317_v15 = vld [vmem:[#allocation5 + $0x18] sm:$0xff]  ;;  %v565_v14 = vld [vmem:[#allocation2 + $0x68] sm:$0xff] }
 0x249   :  { %926 = vmatpush.msrb.mxu2 %v2302_v16  ;;  %946 = vmatpush.msrb.mxu3 %v2305_v17  ;;  %2682 = vst [vmem:[#allocation37_spill] sm:$0xff] %v2317_v15  ;;  %v564_v16 = vld [vmem:[#allocation2 + $0x60] sm:$0xff] }
 0x24a   :  { %887 = vmatpush.msrb.mxu0 %v2308_v18  ;;  %907 = vmatpush.msrb.mxu1 %v2311_v19 }
 0x24b   :  { %927 = vmatpush.msrb.mxu2 %v2314_v20  ;;  %947 = vmatpush.msrb.mxu3 %v2317_v15  ;;  %v566_v15 = vld [vmem:[#allocation2 + $0x70] sm:$0xff] }
 0x2a7   :  { %v585_v13 = vpop.f32.mrf.mxu0  ;;  %v605_v17 = vpop.f32.mrf.mxu1 }
 0x2a8   :  { %v648_v11 = vadd.f32 %v585_v13, %v564_v16  ;;  %v649_v10 = vadd.f32 %v605_v17, %v565_v14 }
 0x2aa   :  { %v1351_v9 = vmul.f32 -1.442695, %v648_v11  ;;  %v1352_v18 = vmul.f32 -1.442695, %v649_v10 }
 0x2ac   :  { %1420 = vpow2.f32 %v1351_v9 }
 0x2ad   :  { %1422 = vpow2.f32 %v1352_v18 }
 0x2ae   :  { %v645_v19 = vpop.f32.mrf.mxu3  ;;  %v625_v2 = vpop.f32.mrf.mxu2 }
 0x2af   :  { %v651_v7 = vadd.f32 %v645_v19, %v567_v8  ;;  %v650_v11 = vadd.f32 %v625_v2, %v566_v15 }
 0x2b1   :  { %v1353_v6 = vmul.f32 -1.442695, %v651_v7 }
 0x2b2   :  { %v1421_v5 = vpop.eup %1420 }
 0x2b3   :  { %v1423_v20 = vpop.eup %1422  ;;  %v655_v4 = vadd.f32 1.0, %v1421_v5  ;;  %1424 = vpow2.f32 %v1353_v6 }
 0x2b4   :  { %v674_v3 = vadd.f32 1.0, %v1423_v20 }
 0x2b5   :  { %1426 = vrcp.f32 %v655_v4  ;;  %v667_v7 = vand.u32 2147483648, %v655_v4  ;;  %v665_v6 = vand.u32 2147483647, %v655_v4  ;;  %vm661_vm6 = vweird.f32 %v655_v4 }
 0x2b6   :  { %1428 = vrcp.f32 %v674_v3  ;;  %v686_v18 = vand.u32 2147483648, %v674_v3  ;;  %v684_v20 = vand.u32 2147483647, %v674_v3  ;;  %vm680_vm7 = vweird.f32 %v674_v3 }
 0x2b7   :  { %vm666_vm10 = vcmp.eq.f32.partialorder %v665_v6, 8.507059e+37 }
 0x2b8   :  { %vm685_vm11 = vcmp.eq.f32.partialorder %v684_v20, 8.507059e+37  ;;  %v2690_v20 = vld [vmem:[#allocation16_spill] sm:$0xff] }
 0x2b9   :  { %v1425_v1 = vpop.eup %1424 }
 0x2ba   :  { %v694_v13 = vadd.f32 1.0, %v1425_v1  ;;  %v668_v1 = vor.u32 1.1754944e-38, %v667_v7 }
 0x2bb   :  { %v1427_v14 = vpop.eup %1426 }
 0x2bc   :  { %v1429_v10 = vpop.eup %1428  ;;  %v657_v9 = vmul.f32 %v1427_v14, %v655_v4  ;;  %1430 = vrcp.f32 %v694_v13  ;;  %vm662_vm4 = vweird.f32 %v1427_v14  ;;  %v706_v7 = vand.u32 2147483648, %v694_v13 }
 0x2bd   :  { %v676_v16 = vmul.f32 %v1429_v10, %v674_v3  ;;  %1432 = vtanh.f32 %v650_v11  ;;  %vm681_vm5 = vweird.f32 %v1429_v10  ;;  %vm663_vm8 = vmor %vm661_vm6, %vm662_vm4  ;;  %vm700_vm13 = vweird.f32 %v694_v13 }
 0x2be   :  { %v658_v17 = vsub.f32 1.0, %v657_v9  ;;  %vm682_vm9 = vmor %vm680_vm7, %vm681_vm5  ;;  %v687_v9 = vor.u32 1.1754944e-38, %v686_v18  ;;  %v707_v18 = vor.u32 1.1754944e-38, %v706_v7  ;;  %v2701_v7 = vld [vmem:[#allocation24_spill] sm:$0xff] }
 0x2bf   :  { %v677_v8 = vsub.f32 1.0, %v676_v16 }
 0x2c0   :  { %v659_v5 = vmul.f32 %v1427_v14, %v658_v17 }
 0x2c1   :  { %v678_v19 = vmul.f32 %v1429_v10, %v677_v8 }
 0x2c2   :  { %v1431_v58 = vpop.eup %1430  ;;  %v660_v53 = vadd.f32 %v1427_v14, %v659_v5 }
 0x2c3   :  { %v679_v2 = vadd.f32 %v1429_v10, %v678_v19  ;;  %v696_v15 = vmul.f32 %v1431_v58, %v694_v13  ;;  %v1433_v11 = vpop.eup %1432  ;;  %vm701_vm12 = vweird.f32 %v1431_v58 }
 0x2c4   :  { %v664_v16 = vsel %vm663_vm8, %v1427_v14, %v660_v53  ;;  %v704_v53 = vand.u32 2147483647, %v694_v13  ;;  %vm702_vm14 = vmor %vm700_vm13, %vm701_vm12  ;;  %v2689_v13 = vld [vmem:[#allocation15_spill] sm:$0xff] }
 0x2c5   :  { %v669_v45 = vsel %vm666_vm10, %v668_v1, %v664_v16  ;;  %v683_v17 = vsel %vm682_vm9, %v1429_v10, %v679_v2  ;;  %v697_v38 = vsub.f32 1.0, %v696_v15  ;;  %v2691_v1 = vld [vmem:[#allocation17_spill] sm:$0xff]  ;;  %v2693_v15 = vld [vmem:[#allocation18_spill] sm:$0xff]  ;;  %v2695_v16 = vld [vmem:[#allocation20_spill] sm:$0xff] }
 0x2c6   :  { %v688_v8 = vsel %vm685_vm11, %v687_v9, %v683_v17  ;;  %v711_v56 = vmul.f32 %v1433_v11, %v669_v45  ;;  %vm705_vm15 = vcmp.eq.f32.partialorder %v704_v53, 8.507059e+37  ;;  %v2687_v45 = vld [vmem:[#allocation14_spill] sm:$0xff]  ;;  %v2692_v2 = vld [vmem:[#allocation33_spill] sm:$0xff]  ;;  %v2694_v9 = vld [vmem:[#allocation19_spill] sm:$0xff] }
 0x2c7   :  { %v710_v51 = vmul.f32 %v688_v8, %v2125_v12  ;;  %v698_v5 = vmul.f32 %v1431_v58, %v697_v38  ;;  %v2683_v12 = vld [vmem:[#allocation11_spill] sm:$0xff]  ;;  %v2686_v38 = vld [vmem:[#allocation13_spill] sm:$0xff]  ;;  %v2696_v11 = vld [vmem:[#allocation34_spill] sm:$0xff] }
 0x2c8   :  { %v2697_v17 = vld [vmem:[#allocation21_spill] sm:$0xff]  ;;  %v2698_v8 = vld [vmem:[#allocation22_spill] sm:$0xff] }
 0x2c9   :  { %v2321_v4 = vadd.f32 %v711_v56, %v710_v51  ;;  %v699_v3 = vadd.f32 %v1431_v58, %v698_v5  ;;  %v2684_v51 = vld [vmem:[#allocation25_spill] sm:$0xff]  ;;  %v2685_v56 = vld [vmem:[#allocation12_spill] sm:$0xff]  ;;  %v2699_v5 = vld [vmem:[#allocation23_spill] sm:$0xff] }
 0x2ca   :  { %v2702_v53 = vld [vmem:[#allocation26_spill] sm:$0xff] }
 0x2cb   :  { %1434 = vtanh.f32 %v2321_v4  ;;  %v703_v14 = vsel %vm702_vm14, %v1431_v58, %v699_v3  ;;  %v2688_v58 = vld [vmem:[#allocation29_spill] sm:$0xff]  ;;  %v2700_v3 = vld [vmem:[#allocation35_spill] sm:$0xff] }
 0x2cc   :  { %v708_v6 = vsel %vm705_vm15, %v707_v18, %v703_v14  ;;  %v2703_v14 = vld [vmem:[#allocation27_spill] sm:$0xff]  ;;  %v2704_v18 = vld [vmem:[#allocation36_spill] sm:$0xff] }
 0x2d1   :  { %v1435_v10 = vpop.eup %1434 }
 0x2d2   :  { %v714_v19 = vmul.f32 %v1435_v10, %v708_v6  ;;  %v2705_v10 = vld [vmem:[#allocation28_spill] sm:$0xff]  ;;  %v2706_v6 = vld [vmem:[#allocation30_spill] sm:$0xff] }
 0x2d4   :  { %736 = vmatmul.f32.vlgmr.msra.gmra.mxu0 %v714_v19  ;;  %756 = vmatmul.f32.vlgmr.msra.gmra.mxu1 %v714_v19 }
 0x2d5   :  { %776 = vmatmul.f32.vlgmr.msra.gmra.mxu2 %v714_v19  ;;  %796 = vmatmul.f32.vlgmr.msra.gmra.mxu3 %v714_v19  ;;  %v2707_v19 = vld [vmem:[#allocation31_spill] sm:$0xff] }
 0x2d6   :  { %1024 = vmatpush.msra.mxu0 %v2128_v62  ;;  %1044 = vmatpush.msra.mxu1 %v2131_v21 }
 0x2d7   :  { %1064 = vmatpush.msra.mxu2 %v2134_v22  ;;  %1084 = vmatpush.msra.mxu3 %v2137_v23 }
 0x2d8   :  { %1025 = vmatpush.msra.mxu0 %v2140_v24  ;;  %1045 = vmatpush.msra.mxu1 %v2143_v25 }
 0x2d9   :  { %1065 = vmatpush.msra.mxu2 %v2146_v26  ;;  %1085 = vmatpush.msra.mxu3 %v2149_v27 }
 0x2da   :  { %1026 = vmatpush.msra.mxu0 %v2152_v28  ;;  %1046 = vmatpush.msra.mxu1 %v2155_v29 }
 0x2db   :  { %1066 = vmatpush.msra.mxu2 %v2158_v30  ;;  %1086 = vmatpush.msra.mxu3 %v2161_v31 }
 0x2dc   :  { %1027 = vmatpush.msra.mxu0 %v2164_v32  ;;  %1047 = vmatpush.msra.mxu1 %v2167_v33 }
 0x2dd   :  { %1067 = vmatpush.msra.mxu2 %v2170_v35  ;;  %1087 = vmatpush.msra.mxu3 %v2173_v39 }
 0x2de   :  { %1028 = vmatpush.msra.mxu0 %v2176_v43  ;;  %1048 = vmatpush.msra.mxu1 %v2179_v47 }
 0x2df   :  { %1068 = vmatpush.msra.mxu2 %v2182_v60  ;;  %1088 = vmatpush.msra.mxu3 %v2185_v44 }
 0x2e0   :  { %1029 = vmatpush.msra.mxu0 %v2188_v34  ;;  %1049 = vmatpush.msra.mxu1 %v2191_v36 }
 0x2e1   :  { %1069 = vmatpush.msra.mxu2 %v2194_v37  ;;  %1089 = vmatpush.msra.mxu3 %v2197_v40 }
 0x2e2   :  { %1030 = vmatpush.msra.mxu0 %v2200_v49  ;;  %1050 = vmatpush.msra.mxu1 %v2203_v46 }
 0x2e3   :  { %1070 = vmatpush.msra.mxu2 %v2206_v55  ;;  %1090 = vmatpush.msra.mxu3 %v2209_v48 }
 0x2e4   :  { %1031 = vmatpush.msra.mxu0 %v2212_v61  ;;  %1051 = vmatpush.msra.mxu1 %v2215_v54 }
 0x2e5   :  { %1071 = vmatpush.msra.mxu2 %v2218_v50  ;;  %1091 = vmatpush.msra.mxu3 %v2221_v42 }
 0x2e6   :  { %1032 = vmatpush.msra.mxu0 %v2224_v52  ;;  %1052 = vmatpush.msra.mxu1 %v2227_v63 }
 0x2e7   :  { %1072 = vmatpush.msra.mxu2 %v2230_v57  ;;  %1092 = vmatpush.msra.mxu3 %v2233_v0 }
 0x2e8   :  { %1033 = vmatpush.msra.mxu0 %v2236_v41  ;;  %1053 = vmatpush.msra.mxu1 %v2239_v59 }
 0x2e9   :  { %1073 = vmatpush.msra.mxu2 %v2683_v12  ;;  %1093 = vmatpush.msra.mxu3 %v2684_v51 }
 0x2ea   :  { %1034 = vmatpush.msra.mxu0 %v2685_v56  ;;  %1054 = vmatpush.msra.mxu1 %v2686_v38 }
 0x2eb   :  { %1074 = vmatpush.msra.mxu2 %v2687_v45  ;;  %1094 = vmatpush.msra.mxu3 %v2688_v58 }
 0x2ec   :  { %1035 = vmatpush.msra.mxu0 %v2689_v13  ;;  %1055 = vmatpush.msra.mxu1 %v2690_v20 }
 0x2ed   :  { %1075 = vmatpush.msra.mxu2 %v2691_v1  ;;  %1095 = vmatpush.msra.mxu3 %v2692_v2 }
 0x2ee   :  { %1036 = vmatpush.msra.mxu0 %v2693_v15  ;;  %1056 = vmatpush.msra.mxu1 %v2694_v9 }
 0x2ef   :  { %1076 = vmatpush.msra.mxu2 %v2695_v16  ;;  %1096 = vmatpush.msra.mxu3 %v2696_v11 }
 0x2f0   :  { %1037 = vmatpush.msra.mxu0 %v2697_v17  ;;  %1057 = vmatpush.msra.mxu1 %v2698_v8  ;;  %v2708_v17 = vld [vmem:[#allocation37_spill] sm:$0xff]  ;;  %v716_v8 = vld [vmem:[#allocation2 + $0x80] sm:$0xff] }
 0x2f1   :  { %1077 = vmatpush.msra.mxu2 %v2699_v5  ;;  %1097 = vmatpush.msra.mxu3 %v2700_v3  ;;  %v717_v5 = vld [vmem:[#allocation2 + $0x88] sm:$0xff] }
 0x2f2   :  { %1038 = vmatpush.msra.mxu0 %v2701_v7  ;;  %1058 = vmatpush.msra.mxu1 %v2702_v53 }
 0x2f3   :  { %1078 = vmatpush.msra.mxu2 %v2703_v14  ;;  %1098 = vmatpush.msra.mxu3 %v2704_v18  ;;  %v719_v14 = vld [vmem:[#allocation2 + $0x98] sm:$0xff] }
 0x2f4   :  { %1039 = vmatpush.msra.mxu0 %v2705_v10  ;;  %1059 = vmatpush.msra.mxu1 %v2706_v6 }
 0x2f5   :  { %1079 = vmatpush.msra.mxu2 %v2707_v19  ;;  %1099 = vmatpush.msra.mxu3 %v2708_v17  ;;  %v718_v17 = vld [vmem:[#allocation2 + $0x90] sm:$0xff] }
 0x351   :  { %v737_v11 = vpop.f32.mrf.mxu0  ;;  %v757_v3 = vpop.f32.mrf.mxu1 }
 0x352   :  { %v800_v16 = vadd.f32 %v737_v11, %v716_v8  ;;  %v801_v7 = vadd.f32 %v757_v3, %v717_v5 }
 0x354   :  { %v1354_v9 = vmul.f32 -1.442695, %v800_v16  ;;  %v1355_v53 = vmul.f32 -1.442695, %v801_v7 }
 0x356   :  { %1436 = vpow2.f32 %v1354_v9 }
 0x357   :  { %1438 = vpow2.f32 %v1355_v53 }
 0x358   :  { %v797_v18 = vpop.f32.mrf.mxu3  ;;  %v777_v20 = vpop.f32.mrf.mxu2 }
 0x359   :  { %v803_v15 = vadd.f32 %v797_v18, %v719_v14  ;;  %v802_v16 = vadd.f32 %v777_v20, %v718_v17 }
 0x35b   :  { %v1356_v10 = vmul.f32 -1.442695, %v803_v15 }
 0x35c   :  { %v1437_v2 = vpop.eup %1436 }
 0x35d   :  { %v1439_v6 = vpop.eup %1438  ;;  %v807_v1 = vadd.f32 1.0, %v1437_v2  ;;  %1440 = vpow2.f32 %v1356_v10 }
 0x35e   :  { %v826_v19 = vadd.f32 1.0, %v1439_v6 }
 0x35f   :  { %1442 = vrcp.f32 %v807_v1  ;;  %v819_v15 = vand.u32 2147483648, %v807_v1  ;;  %v817_v18 = vand.u32 2147483647, %v807_v1  ;;  %vm813_vm2 = vweird.f32 %v807_v1 }
 0x360   :  { %1444 = vrcp.f32 %v826_v19  ;;  %v838_v14 = vand.u32 2147483648, %v826_v19  ;;  %v836_v6 = vand.u32 2147483647, %v826_v19  ;;  %vm832_vm3 = vweird.f32 %v826_v19 }
 0x361   :  { %vm818_vm6 = vcmp.eq.f32.partialorder %v817_v18, 8.507059e+37 }
 0x362   :  { %vm837_vm7 = vcmp.eq.f32.partialorder %v836_v6, 8.507059e+37 }
 0x363   :  { %v1441_v13 = vpop.eup %1440 }
 0x364   :  { %v846_v11 = vadd.f32 1.0, %v1441_v13  ;;  %v820_v13 = vor.u32 1.1754944e-38, %v819_v15 }
 0x365   :  { %v1443_v8 = vpop.eup %1442 }
 0x366   :  { %v1445_v5 = vpop.eup %1444  ;;  %v809_v9 = vmul.f32 %v1443_v8, %v807_v1  ;;  %1446 = vrcp.f32 %v846_v11  ;;  %vm814_vm0 = vweird.f32 %v1443_v8  ;;  %v858_v15 = vand.u32 2147483648, %v846_v11 }
 0x367   :  { %v828_v3 = vmul.f32 %v1445_v5, %v826_v19  ;;  %1448 = vtanh.f32 %v802_v16  ;;  %vm833_vm1 = vweird.f32 %v1445_v5  ;;  %vm815_vm4 = vmor %vm813_vm2, %vm814_vm0  ;;  %vm852_vm9 = vweird.f32 %v846_v11 }
 0x368   :  { %v810_v7 = vsub.f32 1.0, %v809_v9  ;;  %vm834_vm5 = vmor %vm832_vm3, %vm833_vm1  ;;  %v839_v9 = vor.u32 1.1754944e-38, %v838_v14  ;;  %v859_v14 = vor.u32 1.1754944e-38, %v858_v15 }
 0x369   :  { %v829_v53 = vsub.f32 1.0, %v828_v3 }
 0x36a   :  { %v811_v2 = vmul.f32 %v1443_v8, %v810_v7 }
 0x36b   :  { %v830_v10 = vmul.f32 %v1445_v5, %v829_v53 }
 0x36c   :  { %v1447_v58 = vpop.eup %1446  ;;  %v812_v45 = vadd.f32 %v1443_v8, %v811_v2 }
 0x36d   :  { %v831_v20 = vadd.f32 %v1445_v5, %v830_v10  ;;  %v848_v17 = vmul.f32 %v1447_v58, %v846_v11  ;;  %v1449_v16 = vpop.eup %1448  ;;  %vm853_vm8 = vweird.f32 %v1447_v58 }
 0x36e   :  { %v816_v3 = vsel %vm815_vm4, %v1443_v8, %v812_v45  ;;  %v856_v45 = vand.u32 2147483647, %v846_v11  ;;  %vm854_vm10 = vmor %vm852_vm9, %vm853_vm8 }
 0x36f   :  { %v821_v38 = vsel %vm818_vm6, %v820_v13, %v816_v3  ;;  %v835_v7 = vsel %vm834_vm5, %v1445_v5, %v831_v20  ;;  %v849_v56 = vsub.f32 1.0, %v848_v17 }
 0x370   :  { %v840_v53 = vsel %vm837_vm7, %v839_v9, %v835_v7  ;;  %v863_v51 = vmul.f32 %v1449_v16, %v821_v38  ;;  %vm857_vm11 = vcmp.eq.f32.partialorder %v856_v45, 8.507059e+37  ;;  %v870_v38 = vld [vmem:[#allocation2 + $0xb0] sm:$0xff] }
 0x371   :  { %v862_v12 = vmul.f32 %v840_v53, %v2321_v4  ;;  %v850_v2 = vmul.f32 %v1447_v58, %v849_v56 }
 0x373   :  { %v2389_v1 = vadd.f32 %v863_v51, %v862_v12  ;;  %v851_v19 = vadd.f32 %v1447_v58, %v850_v2 }
 0x375   :  { %1450 = vtanh.f32 %v2389_v1  ;;  %v855_v8 = vsel %vm854_vm10, %v1447_v58, %v851_v19 }
 0x376   :  { %v860_v18 = vsel %vm857_vm11, %v859_v14, %v855_v8 }
 0x37b   :  { %v1451_v5 = vpop.eup %1450 }
 0x37c   :  { %v866_v10 = vmul.f32 %v1451_v5, %v860_v18 }
 0x37e   :  { %888 = vmatmul.f32.vlgmr.msrb.gmra.mxu0 %v866_v10  ;;  %908 = vmatmul.f32.vlgmr.msrb.gmra.mxu1 %v866_v10 }
 0x37f   :  { %928 = vmatmul.f32.vlgmr.msrb.gmra.mxu2 %v866_v10  ;;  %948 = vmatmul.f32.vlgmr.msrb.gmra.mxu3 %v866_v10 }
 0x380   :  { %1176 = vmatpush.msrb.mxu0 %v2128_v62  ;;  %1196 = vmatpush.msrb.mxu1 %v2131_v21  ;;  %v2709_v62 = vld [vmem:[#allocation11_spill] sm:$0xff]  ;;  %v2710_v21 = vld [vmem:[#allocation25_spill] sm:$0xff] }
 0x381   :  { %1216 = vmatpush.msrb.mxu2 %v2134_v22  ;;  %1236 = vmatpush.msrb.mxu3 %v2137_v23  ;;  %v2711_v22 = vld [vmem:[#allocation12_spill] sm:$0xff]  ;;  %v2712_v23 = vld [vmem:[#allocation13_spill] sm:$0xff] }
 0x382   :  { %1177 = vmatpush.msrb.mxu0 %v2140_v24  ;;  %1197 = vmatpush.msrb.mxu1 %v2143_v25  ;;  %v2713_v24 = vld [vmem:[#allocation14_spill] sm:$0xff]  ;;  %v2714_v25 = vld [vmem:[#allocation29_spill] sm:$0xff] }
 0x383   :  { %1217 = vmatpush.msrb.mxu2 %v2146_v26  ;;  %1237 = vmatpush.msrb.mxu3 %v2149_v27  ;;  %v2715_v26 = vld [vmem:[#allocation15_spill] sm:$0xff]  ;;  %v2716_v27 = vld [vmem:[#allocation16_spill] sm:$0xff] }
 0x384   :  { %1178 = vmatpush.msrb.mxu0 %v2152_v28  ;;  %1198 = vmatpush.msrb.mxu1 %v2155_v29  ;;  %v2717_v28 = vld [vmem:[#allocation17_spill] sm:$0xff] }
 0x385   :  { %1218 = vmatpush.msrb.mxu2 %v2158_v30  ;;  %1238 = vmatpush.msrb.mxu3 %v2161_v31  ;;  %v2718_v29 = vld [vmem:[#allocation33_spill] sm:$0xff]  ;;  %v2719_v30 = vld [vmem:[#allocation18_spill] sm:$0xff]  ;;  %v2720_v31 = vld [vmem:[#allocation19_spill] sm:$0xff] }
 0x386   :  { %1179 = vmatpush.msrb.mxu0 %v2164_v32  ;;  %1199 = vmatpush.msrb.mxu1 %v2167_v33  ;;  %v2721_v32 = vld [vmem:[#allocation20_spill] sm:$0xff]  ;;  %v2722_v33 = vld [vmem:[#allocation34_spill] sm:$0xff] }
 0x387   :  { %1219 = vmatpush.msrb.mxu2 %v2170_v35  ;;  %1239 = vmatpush.msrb.mxu3 %v2173_v39  ;;  %v2723_v35 = vld [vmem:[#allocation21_spill] sm:$0xff]  ;;  %v2724_v39 = vld [vmem:[#allocation22_spill] sm:$0xff] }
 0x388   :  { %1180 = vmatpush.msrb.mxu0 %v2176_v43  ;;  %1200 = vmatpush.msrb.mxu1 %v2179_v47  ;;  %v2725_v43 = vld [vmem:[#allocation23_spill] sm:$0xff] }
 0x389   :  { %1220 = vmatpush.msrb.mxu2 %v2182_v60  ;;  %1240 = vmatpush.msrb.mxu3 %v2185_v44  ;;  %v2726_v47 = vld [vmem:[#allocation35_spill] sm:$0xff]  ;;  %v2727_v60 = vld [vmem:[#allocation24_spill] sm:$0xff]  ;;  %v2728_v44 = vld [vmem:[#allocation26_spill] sm:$0xff] }
 0x38a   :  { %1181 = vmatpush.msrb.mxu0 %v2188_v34  ;;  %1201 = vmatpush.msrb.mxu1 %v2191_v36  ;;  %v2729_v34 = vld [vmem:[#allocation27_spill] sm:$0xff]  ;;  %v2730_v36 = vld [vmem:[#allocation36_spill] sm:$0xff] }
 0x38b   :  { %1221 = vmatpush.msrb.mxu2 %v2194_v37  ;;  %1241 = vmatpush.msrb.mxu3 %v2197_v40  ;;  %v2731_v37 = vld [vmem:[#allocation28_spill] sm:$0xff]  ;;  %v2732_v40 = vld [vmem:[#allocation30_spill] sm:$0xff] }
 0x38c   :  { %1182 = vmatpush.msrb.mxu0 %v2200_v49  ;;  %1202 = vmatpush.msrb.mxu1 %v2203_v46  ;;  %v2733_v49 = vld [vmem:[#allocation31_spill] sm:$0xff]  ;;  %v2734_v46 = vld [vmem:[#allocation37_spill] sm:$0xff] }
 0x38d   :  { %1222 = vmatpush.msrb.mxu2 %v2206_v55  ;;  %1242 = vmatpush.msrb.mxu3 %v2209_v48  ;;  %v868_v55 = vld [vmem:[#allocation2 + $0xa0] sm:$0xff]  ;;  %v869_v48 = vld [vmem:[#allocation2 + $0xa8] sm:$0xff] }
 0x38e   :  { %1183 = vmatpush.msrb.mxu0 %v2212_v61  ;;  %1203 = vmatpush.msrb.mxu1 %v2215_v54 }
 0x38f   :  { %1223 = vmatpush.msrb.mxu2 %v2218_v50  ;;  %1243 = vmatpush.msrb.mxu3 %v2221_v42 }
 0x390   :  { %1184 = vmatpush.msrb.mxu0 %v2224_v52  ;;  %1204 = vmatpush.msrb.mxu1 %v2227_v63 }
 0x391   :  { %1224 = vmatpush.msrb.mxu2 %v2230_v57  ;;  %1244 = vmatpush.msrb.mxu3 %v2233_v0  ;;  %v871_v57 = vld [vmem:[#allocation2 + $0xb8] sm:$0xff] }
 0x392   :  { %1185 = vmatpush.msrb.mxu0 %v2236_v41  ;;  %1205 = vmatpush.msrb.mxu1 %v2239_v59 }
 0x393   :  { %1225 = vmatpush.msrb.mxu2 %v2709_v62  ;;  %1245 = vmatpush.msrb.mxu3 %v2710_v21 }
 0x394   :  { %1186 = vmatpush.msrb.mxu0 %v2711_v22  ;;  %1206 = vmatpush.msrb.mxu1 %v2712_v23 }
 0x395   :  { %1226 = vmatpush.msrb.mxu2 %v2713_v24  ;;  %1246 = vmatpush.msrb.mxu3 %v2714_v25 }
 0x396   :  { %1187 = vmatpush.msrb.mxu0 %v2715_v26  ;;  %1207 = vmatpush.msrb.mxu1 %v2716_v27 }
 0x397   :  { %1227 = vmatpush.msrb.mxu2 %v2717_v28  ;;  %1247 = vmatpush.msrb.mxu3 %v2718_v29 }
 0x398   :  { %1188 = vmatpush.msrb.mxu0 %v2719_v30  ;;  %1208 = vmatpush.msrb.mxu1 %v2720_v31 }
 0x399   :  { %1228 = vmatpush.msrb.mxu2 %v2721_v32  ;;  %1248 = vmatpush.msrb.mxu3 %v2722_v33 }
 0x39a   :  { %1189 = vmatpush.msrb.mxu0 %v2723_v35  ;;  %1209 = vmatpush.msrb.mxu1 %v2724_v39 }
 0x39b   :  { %1229 = vmatpush.msrb.mxu2 %v2725_v43  ;;  %1249 = vmatpush.msrb.mxu3 %v2726_v47 }
 0x39c   :  { %1190 = vmatpush.msrb.mxu0 %v2727_v60  ;;  %1210 = vmatpush.msrb.mxu1 %v2728_v44 }
 0x39d   :  { %1230 = vmatpush.msrb.mxu2 %v2729_v34  ;;  %1250 = vmatpush.msrb.mxu3 %v2730_v36  ;;  %v1021_v34 = vld [vmem:[#allocation2 + $0xc8] sm:$0xff] }
 0x39e   :  { %1191 = vmatpush.msrb.mxu0 %v2731_v37  ;;  %1211 = vmatpush.msrb.mxu1 %v2732_v40 }
 0x39f   :  { %1231 = vmatpush.msrb.mxu2 %v2733_v49  ;;  %1251 = vmatpush.msrb.mxu3 %v2734_v46 }
 0x3fb   :  { %v889_v61 = vpop.f32.mrf.mxu0  ;;  %v909_v54 = vpop.f32.mrf.mxu1 }
 0x3fc   :  { %v952_v50 = vadd.f32 %v889_v61, %v868_v55  ;;  %v953_v42 = vadd.f32 %v909_v54, %v869_v48  ;;  %v1023_v48 = vld [vmem:[#allocation2 + $0xd8] sm:$0xff] }
 0x3fe   :  { %v1357_v52 = vmul.f32 -1.442695, %v952_v50  ;;  %v1358_v63 = vmul.f32 -1.442695, %v953_v42 }
 0x400   :  { %1452 = vpow2.f32 %v1357_v52 }
 0x401   :  { %1454 = vpow2.f32 %v1358_v63 }
 0x402   :  { %v949_v0 = vpop.f32.mrf.mxu3  ;;  %v929_v58 = vpop.f32.mrf.mxu2 }
 0x403   :  { %v955_v41 = vadd.f32 %v949_v0, %v871_v57  ;;  %v954_v20 = vadd.f32 %v929_v58, %v870_v38  ;;  %v1022_v0 = vld [vmem:[#allocation2 + $0xd0] sm:$0xff] }
 0x405   :  { %v1359_v59 = vmul.f32 -1.442695, %v955_v41 }
 0x406   :  { %v1453_v4 = vpop.eup %1452 }
 0x407   :  { %v1455_v12 = vpop.eup %1454  ;;  %v959_v51 = vadd.f32 1.0, %v1453_v4  ;;  %1456 = vpow2.f32 %v1359_v59 }
 0x408   :  { %v978_v56 = vadd.f32 1.0, %v1455_v12 }
 0x409   :  { %1458 = vrcp.f32 %v959_v51  ;;  %v971_v53 = vand.u32 2147483648, %v959_v51  ;;  %v969_v15 = vand.u32 2147483647, %v959_v51  ;;  %vm965_vm14 = vweird.f32 %v959_v51 }
 0x40a   :  { %1460 = vrcp.f32 %v978_v56  ;;  %v990_v2 = vand.u32 2147483648, %v978_v56  ;;  %v988_v8 = vand.u32 2147483647, %v978_v56  ;;  %vm984_vm15 = vweird.f32 %v978_v56 }
 0x40b   :  { %v972_v18 = vor.u32 1.1754944e-38, %v971_v53  ;;  %vm970_vm2 = vcmp.eq.f32.partialorder %v969_v15, 8.507059e+37 }
 0x40c   :  { %v991_v21 = vor.u32 1.1754944e-38, %v990_v2  ;;  %vm989_vm3 = vcmp.eq.f32.partialorder %v988_v8, 8.507059e+37 }
 0x40d   :  { %v1457_v11 = vpop.eup %1456 }
 0x40e   :  { %v998_v6 = vadd.f32 1.0, %v1457_v11 }
 0x40f   :  { %v1459_v13 = vpop.eup %1458 }
 0x410   :  { %v1461_v17 = vpop.eup %1460  ;;  %v961_v9 = vmul.f32 %v1459_v13, %v959_v51  ;;  %1462 = vrcp.f32 %v998_v6  ;;  %vm966_vm12 = vweird.f32 %v1459_v13  ;;  %v1010_v33 = vand.u32 2147483648, %v998_v6 }
 0x411   :  { %v980_v3 = vmul.f32 %v1461_v17, %v978_v56  ;;  %1464 = vtanh.f32 %v954_v20  ;;  %vm985_vm13 = vweird.f32 %v1461_v17  ;;  %vm967_vm0 = vmor %vm965_vm14, %vm966_vm12  ;;  %vm1004_vm5 = vweird.f32 %v998_v6 }
 0x412   :  { %v962_v16 = vsub.f32 1.0, %v961_v9  ;;  %vm986_vm1 = vmor %vm984_vm15, %vm985_vm13  ;;  %v1008_v35 = vand.u32 2147483647, %v998_v6  ;;  %v1011_v43 = vor.u32 1.1754944e-38, %v1010_v33 }
 0x413   :  { %v981_v7 = vsub.f32 1.0, %v980_v3 }
 0x414   :  { %v963_v19 = vmul.f32 %v1459_v13, %v962_v16  ;;  %vm1009_vm7 = vcmp.eq.f32.partialorder %v1008_v35, 8.507059e+37  ;;  %v1173_v35 = vld [vmem:[#allocation2 + $0xe8] sm:$0xff] }
 0x415   :  { %v982_v45 = vmul.f32 %v1461_v17, %v981_v7 }
 0x416   :  { %v1463_v14 = vpop.eup %1462  ;;  %v964_v5 = vadd.f32 %v1459_v13, %v963_v19 }
 0x417   :  { %v983_v10 = vadd.f32 %v1461_v17, %v982_v45  ;;  %v1000_v62 = vmul.f32 %v1463_v14, %v998_v6  ;;  %v1465_v23 = vpop.eup %1464  ;;  %vm1005_vm4 = vweird.f32 %v1463_v14 }
 0x418   :  { %v968_v22 = vsel %vm967_vm0, %v1459_v13, %v964_v5  ;;  %vm1006_vm6 = vmor %vm1004_vm5, %vm1005_vm4 }
 0x419   :  { %v973_v24 = vsel %vm970_vm2, %v972_v18, %v968_v22  ;;  %v987_v25 = vsel %vm986_vm1, %v1461_v17, %v983_v10  ;;  %v1001_v26 = vsub.f32 1.0, %v1000_v62 }
 0x41a   :  { %v992_v27 = vsel %vm989_vm3, %v991_v21, %v987_v25  ;;  %v1015_v28 = vmul.f32 %v1465_v23, %v973_v24 }
 0x41b   :  { %v1014_v29 = vmul.f32 %v992_v27, %v2389_v1  ;;  %v1002_v30 = vmul.f32 %v1463_v14, %v1001_v26  ;;  %v1020_v1 = vld [vmem:[#allocation2 + $0xc0] sm:$0xff] }
 0x41d   :  { %v2457_v31 = vadd.f32 %v1015_v28, %v1014_v29  ;;  %v1003_v32 = vadd.f32 %v1463_v14, %v1002_v30 }
 0x41f   :  { %1466 = vtanh.f32 %v2457_v31  ;;  %v1007_v39 = vsel %vm1006_vm6, %v1463_v14, %v1003_v32 }
 0x420   :  { %v1012_v60 = vsel %vm1009_vm7, %v1011_v43, %v1007_v39 }
 0x425   :  { %v1467_v47 = vpop.eup %1466 }
 0x426   :  { %v1018_v44 = vmul.f32 %v1467_v47, %v1012_v60 }
 0x428   :  { %1040 = vmatmul.f32.vlgmr.msra.gmra.mxu0 %v1018_v44  ;;  %1060 = vmatmul.f32.vlgmr.msra.gmra.mxu1 %v1018_v44 }
 0x429   :  { %1080 = vmatmul.f32.vlgmr.msra.gmra.mxu2 %v1018_v44  ;;  %1100 = vmatmul.f32.vlgmr.msra.gmra.mxu3 %v1018_v44 }
 0x4a5   :  { %v1041_v36 = vpop.f32.mrf.mxu0  ;;  %v1061_v37 = vpop.f32.mrf.mxu1 }
 0x4a6   :  { %v1104_v40 = vadd.f32 %v1041_v36, %v1020_v1  ;;  %v1105_v49 = vadd.f32 %v1061_v37, %v1021_v34  ;;  %v1175_v34 = vld [vmem:[#allocation2 + $0xf8] sm:$0xff] }
 0x4a8   :  { %v1360_v46 = vmul.f32 -1.442695, %v1104_v40  ;;  %v1361_v55 = vmul.f32 -1.442695, %v1105_v49 }
 0x4aa   :  { %1468 = vpow2.f32 %v1360_v46 }
 0x4ab   :  { %1470 = vpow2.f32 %v1361_v55 }
 0x4ac   :  { %v1101_v61 = vpop.f32.mrf.mxu3  ;;  %v1081_v41 = vpop.f32.mrf.mxu2 }
 0x4ad   :  { %v1107_v54 = vadd.f32 %v1101_v61, %v1023_v48  ;;  %v1106_v51 = vadd.f32 %v1081_v41, %v1022_v0  ;;  %v1174_v61 = vld [vmem:[#allocation2 + $0xf0] sm:$0xff] }
 0x4af   :  { %v1362_v50 = vmul.f32 -1.442695, %v1107_v54 }
 0x4b0   :  { %v1469_v42 = vpop.eup %1468 }
 0x4b1   :  { %v1471_v52 = vpop.eup %1470  ;;  %v1111_v63 = vadd.f32 1.0, %v1469_v42  ;;  %1472 = vpow2.f32 %v1362_v50 }
 0x4b2   :  { %v1130_v57 = vadd.f32 1.0, %v1471_v52 }
 0x4b3   :  { %1474 = vrcp.f32 %v1111_v63  ;;  %v1123_v13 = vand.u32 2147483648, %v1111_v63  ;;  %v1121_v9 = vand.u32 2147483647, %v1111_v63  ;;  %vm1117_vm10 = vweird.f32 %v1111_v63 }
 0x4b4   :  { %1476 = vrcp.f32 %v1130_v57  ;;  %v1142_v20 = vand.u32 2147483648, %v1130_v57  ;;  %v1140_v16 = vand.u32 2147483647, %v1130_v57  ;;  %vm1136_vm11 = vweird.f32 %v1130_v57 }
 0x4b5   :  { %v1124_v2 = vor.u32 1.1754944e-38, %v1123_v13  ;;  %vm1122_vm14 = vcmp.eq.f32.partialorder %v1121_v9, 8.507059e+37 }
 0x4b6   :  { %v1143_v45 = vor.u32 1.1754944e-38, %v1142_v20  ;;  %vm1141_vm15 = vcmp.eq.f32.partialorder %v1140_v16, 8.507059e+37 }
 0x4b7   :  { %v1473_v59 = vpop.eup %1472 }
 0x4b8   :  { %v1150_v4 = vadd.f32 1.0, %v1473_v59 }
 0x4b9   :  { %v1475_v12 = vpop.eup %1474 }
 0x4ba   :  { %v1477_v56 = vpop.eup %1476  ;;  %v1113_v38 = vmul.f32 %v1475_v12, %v1111_v63  ;;  %1478 = vrcp.f32 %v1150_v4  ;;  %vm1118_vm8 = vweird.f32 %v1475_v12  ;;  %v1162_v26 = vand.u32 2147483648, %v1150_v4 }
 0x4bb   :  { %v1132_v58 = vmul.f32 %v1477_v56, %v1130_v57  ;;  %1480 = vtanh.f32 %v1106_v51  ;;  %vm1137_vm9 = vweird.f32 %v1477_v56  ;;  %vm1119_vm12 = vmor %vm1117_vm10, %vm1118_vm8  ;;  %vm1156_vm1 = vweird.f32 %v1150_v4 }
 0x4bc   :  { %v1114_v11 = vsub.f32 1.0, %v1113_v38  ;;  %vm1138_vm13 = vmor %vm1136_vm11, %vm1137_vm9  ;;  %v1160_v27 = vand.u32 2147483647, %v1150_v4  ;;  %v1163_v29 = vor.u32 1.1754944e-38, %v1162_v26 }
 0x4bd   :  { %v1133_v6 = vsub.f32 1.0, %v1132_v58 }
 0x4be   :  { %v1115_v17 = vmul.f32 %v1475_v12, %v1114_v11  ;;  %vm1161_vm3 = vcmp.eq.f32.partialorder %v1160_v27, 8.507059e+37 }
 0x4bf   :  { %v1134_v3 = vmul.f32 %v1477_v56, %v1133_v6 }
 0x4c0   :  { %v1479_v7 = vpop.eup %1478  ;;  %v1116_v53 = vadd.f32 %v1475_v12, %v1115_v17 }
 0x4c1   :  { %v1135_v19 = vadd.f32 %v1477_v56, %v1134_v3  ;;  %v1152_v15 = vmul.f32 %v1479_v7, %v1150_v4  ;;  %v1481_v14 = vpop.eup %1480  ;;  %vm1157_vm0 = vweird.f32 %v1479_v7 }
 0x4c2   :  { %v1120_v8 = vsel %vm1119_vm12, %v1475_v12, %v1116_v53  ;;  %vm1158_vm2 = vmor %vm1156_vm1, %vm1157_vm0 }
 0x4c3   :  { %v1125_v5 = vsel %vm1122_vm14, %v1124_v2, %v1120_v8  ;;  %v1139_v18 = vsel %vm1138_vm13, %v1477_v56, %v1135_v19  ;;  %v1153_v10 = vsub.f32 1.0, %v1152_v15 }
 0x4c4   :  { %v1144_v62 = vsel %vm1141_vm15, %v1143_v45, %v1139_v18  ;;  %v1167_v21 = vmul.f32 %v1481_v14, %v1125_v5 }
 0x4c5   :  { %v1166_v22 = vmul.f32 %v1144_v62, %v2457_v31  ;;  %v1154_v23 = vmul.f32 %v1479_v7, %v1153_v10  ;;  %v1172_v31 = vld [vmem:[#allocation2 + $0xe0] sm:$0xff] }
 0x4c7   :  { %v2461_v24 = vadd.f32 %v1167_v21, %v1166_v22  ;;  %v1155_v25 = vadd.f32 %v1479_v7, %v1154_v23 }
 0x4c9   :  { %1482 = vtanh.f32 %v2461_v24  ;;  %v1159_v28 = vsel %vm1158_vm2, %v1479_v7, %v1155_v25 }
 0x4ca   :  { %v1164_v32 = vsel %vm1161_vm3, %v1163_v29, %v1159_v28 }
 0x4cf   :  { %v1483_v30 = vpop.eup %1482 }
 0x4d0   :  { %v1170_v33 = vmul.f32 %v1483_v30, %v1164_v32 }
 0x4d2   :  { %1192 = vmatmul.f32.vlgmr.msrb.gmra.mxu0 %v1170_v33  ;;  %1212 = vmatmul.f32.vlgmr.msrb.gmra.mxu1 %v1170_v33 }
 0x4d3   :  { %1232 = vmatmul.f32.vlgmr.msrb.gmra.mxu2 %v1170_v33  ;;  %1252 = vmatmul.f32.vlgmr.msrb.gmra.mxu3 %v1170_v33 }
 0x54f   :  { %v1193_v39 = vpop.f32.mrf.mxu0  ;;  %v1213_v43 = vpop.f32.mrf.mxu1 }
 0x550   :  { %v1256_v47 = vadd.f32 %v1193_v39, %v1172_v31  ;;  %v1257_v60 = vadd.f32 %v1213_v43, %v1173_v35 }
 0x552   :  { %v1363_v44 = vmul.f32 -1.442695, %v1256_v47  ;;  %v1364_v1 = vmul.f32 -1.442695, %v1257_v60 }
 0x554   :  { %1484 = vpow2.f32 %v1363_v44 }
 0x555   :  { %1486 = vpow2.f32 %v1364_v1 }
 0x556   :  { %v1253_v36 = vpop.f32.mrf.mxu3  ;;  %v1233_v54 = vpop.f32.mrf.mxu2 }
 0x557   :  { %v1259_v37 = vadd.f32 %v1253_v36, %v1175_v34  ;;  %v1258_v63 = vadd.f32 %v1233_v54, %v1174_v61 }
 0x559   :  { %v1365_v40 = vmul.f32 -1.442695, %v1259_v37 }
 0x55a   :  { %v1485_v49 = vpop.eup %1484 }
 0x55b   :  { %v1487_v46 = vpop.eup %1486  ;;  %v1263_v55 = vadd.f32 1.0, %v1485_v49  ;;  %1488 = vpow2.f32 %v1365_v40 }
 0x55c   :  { %v1282_v48 = vadd.f32 1.0, %v1487_v46 }
 0x55d   :  { %1490 = vrcp.f32 %v1263_v55  ;;  %v1275_v12 = vand.u32 2147483648, %v1263_v55  ;;  %v1273_v38 = vand.u32 2147483647, %v1263_v55  ;;  %vm1269_vm6 = vweird.f32 %v1263_v55 }
 0x55e   :  { %1492 = vrcp.f32 %v1282_v48  ;;  %v1294_v51 = vand.u32 2147483648, %v1282_v48  ;;  %v1292_v11 = vand.u32 2147483647, %v1282_v48  ;;  %vm1288_vm7 = vweird.f32 %v1282_v48 }
 0x55f   :  { %v1276_v20 = vor.u32 1.1754944e-38, %v1275_v12  ;;  %vm1274_vm10 = vcmp.eq.f32.partialorder %v1273_v38, 8.507059e+37 }
 0x560   :  { %v1295_v3 = vor.u32 1.1754944e-38, %v1294_v51  ;;  %vm1293_vm11 = vcmp.eq.f32.partialorder %v1292_v11, 8.507059e+37 }
 0x561   :  { %v1489_v50 = vpop.eup %1488 }
 0x562   :  { %v1302_v42 = vadd.f32 1.0, %v1489_v50 }
 0x563   :  { %v1491_v52 = vpop.eup %1490 }
 0x564   :  { %v1493_v57 = vpop.eup %1492  ;;  %v1265_v0 = vmul.f32 %v1491_v52, %v1263_v55  ;;  %1494 = vrcp.f32 %v1302_v42  ;;  %vm1270_vm4 = vweird.f32 %v1491_v52  ;;  %v1314_v10 = vand.u32 2147483648, %v1302_v42 }
 0x565   :  { %v1284_v41 = vmul.f32 %v1493_v57, %v1282_v48  ;;  %1496 = vtanh.f32 %v1258_v63  ;;  %vm1289_vm5 = vweird.f32 %v1493_v57  ;;  %vm1271_vm8 = vmor %vm1269_vm6, %vm1270_vm4  ;;  %vm1308_vm13 = vweird.f32 %v1302_v42 }
 0x566   :  { %v1266_v59 = vsub.f32 1.0, %v1265_v0  ;;  %vm1290_vm9 = vmor %vm1288_vm7, %vm1289_vm5  ;;  %v1312_v62 = vand.u32 2147483647, %v1302_v42  ;;  %v1315_v22 = vor.u32 1.1754944e-38, %v1314_v10 }
 0x567   :  { %v1285_v4 = vsub.f32 1.0, %v1284_v41 }
 0x568   :  { %v1267_v56 = vmul.f32 %v1491_v52, %v1266_v59  ;;  %vm1313_vm15 = vcmp.eq.f32.partialorder %v1312_v62, 8.507059e+37 }
 0x569   :  { %v1286_v58 = vmul.f32 %v1493_v57, %v1285_v4 }
 0x56a   :  { %v1495_v6 = vpop.eup %1494  ;;  %v1268_v13 = vadd.f32 %v1491_v52, %v1267_v56 }
 0x56b   :  { %v1287_v17 = vadd.f32 %v1493_v57, %v1286_v58  ;;  %v1304_v9 = vmul.f32 %v1495_v6, %v1302_v42  ;;  %v1497_v7 = vpop.eup %1496  ;;  %vm1309_vm12 = vweird.f32 %v1495_v6 }
 0x56c   :  { %v1272_v16 = vsel %vm1271_vm8, %v1491_v52, %v1268_v13  ;;  %vm1310_vm14 = vmor %vm1308_vm13, %vm1309_vm12 }
 0x56d   :  { %v1277_v53 = vsel %vm1274_vm10, %v1276_v20, %v1272_v16  ;;  %v1291_v2 = vsel %vm1290_vm9, %v1493_v57, %v1287_v17  ;;  %v1305_v19 = vsub.f32 1.0, %v1304_v9 }
 0x56e   :  { %v1296_v15 = vsel %vm1293_vm11, %v1295_v3, %v1291_v2  ;;  %v1319_v45 = vmul.f32 %v1497_v7, %v1277_v53 }
 0x56f   :  { %v1318_v8 = vmul.f32 %v1296_v15, %v2461_v24  ;;  %v1306_v14 = vmul.f32 %v1495_v6, %v1305_v19 }
 0x571   :  { %v1320_v5 = vadd.f32 %v1319_v45, %v1318_v8  ;;  %v1307_v18 = vadd.f32 %v1495_v6, %v1306_v14 }
 0x573   :  { %1498 = vtanh.f32 %v1320_v5  ;;  %v1311_v21 = vsel %vm1310_vm14, %v1495_v6, %v1307_v18 }
 0x574   :  { %v1316_v24 = vsel %vm1313_vm15, %v1315_v22, %v1311_v21 }
 0x579   :  { %v1499_v23 = vpop.eup %1498 }
 0x57a   :  { %v1322_v25 = vmul.f32 %v1499_v23, %v1316_v24 }
 0x57c   :  { %1323 = vst [vmem:[#allocation7] sm:$0xff] %v1322_v25 }
 0x57d   :  { %1334 = dma.vmem_to_hbm [thread:$0]  %s1330_s1, 128, %s1332_s23, [#allocation4]  }
 0x57e   :  { %1640 = dma.done.wait [#allocation4], 128  }
 0x57f   :  { %1641 = vsyncadd [#allocation4], 4294967168 }
 0x580   :  { %1339 = vsyncpa [#allocation3], 1 }
 0x581   :  { %1340 = vsyncpa [#allocation6], 1 }
 0x582   :  { %1341 = vsyncpa [#allocation4], 1 }

</bundles_post_ra>
